<compile_context>
chip_gen: v7x
topology: tpu7x:2x2x1
jax: 0.10.0
libtpu: 0.0.40
codegen_flags: <defaults>
</compile_context>

<pallas_src>
import functools

import jax
import jax.numpy as jnp
from jax.experimental import pallas as pl
from jax.experimental.pallas import tpu as pltpu


# ---------------------------------------------------------------------------
# Tile-size helpers
# ---------------------------------------------------------------------------
def _pick_tile_sublane(dim, target):
    """Largest multiple-of-8 tile <= target that divides dim, else full dim."""
    if dim <= target:
        return dim
    cand = (min(target, dim) // 8) * 8
    while cand >= 8:
        if dim % cand == 0:
            return cand
        cand -= 8
    # TODO(synk): ragged (non multiple-of-8) sizes fall back to a full-dim
    # block; fine at demo scale — pad the caller for large ragged S.
    return dim


def _pick_tile_lane(dim, target):
    """Largest multiple-of-128 tile <= target that divides dim, else full dim."""
    if dim <= target:
        return dim
    cand = (min(target, dim) // 128) * 128
    while cand >= 128:
        if dim % cand == 0:
            return cand
        cand -= 128
    return dim


def _heads_per_group(num_heads, head_dim):
    """Smallest head-group whose packed width is lane-aligned (128-multiple)."""
    for g in range(1, num_heads + 1):
        if num_heads % g == 0 and (g * head_dim) % 128 == 0:
            return g
    raise ValueError(
        f"cannot form a lane-aligned head group for num_heads={num_heads}, "
        f"head_dim={head_dim}")


# ---------------------------------------------------------------------------
# Tiled linear (x @ w + b) kernel
# ---------------------------------------------------------------------------
def linear_bias_kernel(x_ref, w_ref, b_ref, o_ref, acc_ref):
    """Grid (i, j, k): o[i,j] = sum_k x[i,k] @ w[k,j] + b[j]."""
    @pl.when(pl.program_id(2) == 0)
    def _init():
        acc_ref[...] = jnp.zeros_like(acc_ref)

    acc_ref[...] += jnp.dot(x_ref[...], w_ref[...],
                            preferred_element_type=jnp.float32)

    @pl.when(pl.program_id(2) == pl.num_programs(2) - 1)
    def _finalize():
        o_ref[...] = (acc_ref[...] + b_ref[...].astype(jnp.float32)
                      ).astype(o_ref.dtype)


def linear_bias(x, w, b, *, tm=512, tn=512, tk=512):
    M, K = x.shape
    _, N = w.shape
    tm = _pick_tile_sublane(M, tm)
    tn = _pick_tile_lane(N, tn)
    tk = _pick_tile_lane(K, tk)
    grid = (M // tm, N // tn, K // tk)
    itemsize = jnp.dtype(x.dtype).itemsize
    return pl.pallas_call(
        linear_bias_kernel,
        out_shape=jax.ShapeDtypeStruct((M, N), x.dtype),
        grid_spec=pltpu.PrefetchScalarGridSpec(
            num_scalar_prefetch=0,
            grid=grid,
            in_specs=[
                pl.BlockSpec((tm, tk), lambda i, j, k: (i, k)),
                pl.BlockSpec((tk, tn), lambda i, j, k: (k, j)),
                pl.BlockSpec((1, tn), lambda i, j, k: (0, j)),
            ],
            out_specs=pl.BlockSpec((tm, tn), lambda i, j, k: (i, j)),
            scratch_shapes=[pltpu.VMEM((tm, tn), jnp.float32)],
        ),
        compiler_params=pltpu.CompilerParams(
            dimension_semantics=("parallel", "parallel", "arbitrary"),
        ),
        cost_estimate=pl.CostEstimate(
            flops=2 * M * N * K,
            transcendentals=0,
            bytes_accessed=(M * K * (N // tn) + K * N * (M // tm)
                            + M * N + N) * itemsize,
        ),
    )(x, w, b.reshape(1, N))


# ---------------------------------------------------------------------------
# Flash-style causal attention, driven directly off the packed qkv [S, 3H]
# ---------------------------------------------------------------------------
def flash_attn_kernel(q_ref, k_ref, v_ref, o_ref, m_scr, l_scr, acc_scr, *,
                      heads_per_group, head_dim, tq, tkv):
    qi = pl.program_id(1)
    ki = pl.program_id(2)
    q_start = qi * tq
    kv_start = ki * tkv

    @pl.when(ki == 0)
    def _init():
        # Finite (-1e30, not -inf) init is safe because kv tile ki == 0 always
        # executes (kv_start = 0 <= q_start + tq - 1 for every q tile), so
        # every query row accumulates at least one unmasked key before the
        # finalize.  Revisit if the mask ever becomes non-causal (e.g. sliding
        # window).
        m_scr[...] = jnp.full_like(m_scr, -1e30)
        l_scr[...] = jnp.zeros_like(l_scr)
        acc_scr[...] = jnp.zeros_like(acc_scr)

    def _accumulate(masked):
        if masked:
            row = q_start + jax.lax.broadcasted_iota(jnp.int32, (tq, tkv), 0)
            col = kv_start + jax.lax.broadcasted_iota(jnp.int32, (tq, tkv), 1)
            causal = col <= row
        # Static unroll over the small, lane-aligned head group only (bounded
        # vreg pressure; the full head axis lives in the grid).
        for h in range(heads_per_group):
            sl = slice(h * head_dim, (h + 1) * head_dim)
            q = q_ref[:, sl]            # Q columns already carry the scale
            k = k_ref[:, sl]
            v = v_ref[:, sl]
            s = jax.lax.dot_general(q, k, (((1,), (1,)), ((), ())),
                                    preferred_element_type=jnp.float32)
            if masked:
                s = jnp.where(causal, s, -1e30)
            m_prev = m_scr[h]
            m_new = jnp.maximum(m_prev, jnp.max(s, axis=-1, keepdims=True))
            alpha = jnp.exp(m_prev - m_new)
            p = jnp.exp(s - m_new)
            l_scr[h] = alpha * l_scr[h] + jnp.sum(p, axis=-1, keepdims=True)
            acc_scr[h] = alpha * acc_scr[h] + jax.lax.dot_general(
                p.astype(v.dtype), v, (((1,), (0,)), ((), ())),
                preferred_element_type=jnp.float32)
            m_scr[h] = m_new

    # Fully-unmasked tiles (strictly below the diagonal): no iota / compare /
    # select — pure MXU + online-softmax work.
    @pl.when(kv_start + tkv - 1 <= q_start)
    def _full_tiles():
        _accumulate(masked=False)

    # Diagonal-band tiles: apply the causal mask.
    @pl.when(jnp.logical_and(kv_start + tkv - 1 > q_start,
                             kv_start <= q_start + tq - 1))
    def _band_tiles():
        _accumulate(masked=True)

    # kv tiles strictly above the diagonal fall through: no compute, and the
    # clamped K/V index_map means they were never DMA'd either.

    @pl.when(ki == pl.num_programs(2) - 1)
    def _finalize():
        outs = []
        for h in range(heads_per_group):
            inv_l = pl.reciprocal(l_scr[h], approx=False)   # exact: bf16 I/O
            outs.append(acc_scr[h] * inv_l)
        # One lane-dense (tq, group_width) store instead of per-head
        # head_dim-wide masked stores.
        o_ref[...] = jnp.concatenate(outs, axis=-1).astype(o_ref.dtype)


def causal_attention_from_qkv(qkv, num_heads, head_dim, out_dtype, *,
                              tq=256, tkv=256):
    """qkv: [S, 3H] packed as [q(all heads) | k(all heads) | v(all heads)],
    with the softmax scale already folded into the q columns.

    Returns attention output [S, H] with heads packed along the feature axis
    (ready for c_proj, no transposes needed)."""
    S = qkv.shape[0]
    H = num_heads * head_dim
    assert qkv.shape[1] == 3 * H
    hpg = _heads_per_group(num_heads, head_dim)
    gw = hpg * head_dim                  # lane width of one head group
    num_groups = num_heads // hpg
    assert gw % 128 == 0
    tq = _pick_tile_sublane(S, tq)
    tkv = _pick_tile_sublane(S, tkv)
    nq, nkv = S // tq, S // tkv
    grid = (num_groups, nq, nkv)

    # K/V index maps clamp the kv block index to the last causally-needed
    # block for this q tile: above-diagonal grid steps repeat the previous
    # block index, so Pallas issues no new DMA for them.
    def q_map(hg, qi, ki):
        return (qi, hg)

    def k_map(hg, qi, ki):
        return (jnp.minimum(ki, (qi * tq + tq - 1) // tkv), num_groups + hg)

    def v_map(hg, qi, ki):
        return (jnp.minimum(ki, (qi * tq + tq - 1) // tkv), 2 * num_groups + hg)

    kernel = functools.partial(flash_attn_kernel, heads_per_group=hpg,
                               head_dim=head_dim, tq=tq, tkv=tkv)
    itemsize = jnp.dtype(out_dtype).itemsize
    # Causal: ~half the kv tiles execute; K/V re-streamed ~nq/2 times, Q
    # re-streamed ~nkv/2 times (clamped DMA already accounted for).
    flops = 2 * num_heads * S * S * head_dim                 # (qk + pv) / 2
    bytes_accessed = itemsize * (S * H * (nkv + 1) // 2      # Q
                                 + 2 * S * H * (nq + 1) // 2  # K, V
                                 + S * H)                     # out
    return pl.pallas_call(
        kernel,
        out_shape=jax.ShapeDtypeStruct((S, H), out_dtype),
        grid_spec=pltpu.PrefetchScalarGridSpec(
            num_scalar_prefetch=0,
            grid=grid,
            in_specs=[
                pl.BlockSpec((tq, gw), q_map),
                pl.BlockSpec((tkv, gw), k_map),
                pl.BlockSpec((tkv, gw), v_map),
            ],
            out_specs=pl.BlockSpec((tq, gw), q_map),
            scratch_shapes=[
                pltpu.VMEM((hpg, tq, 1), jnp.float32),         # m
                pltpu.VMEM((hpg, tq, 1), jnp.float32),         # l
                pltpu.VMEM((hpg, tq, head_dim), jnp.float32),  # acc
            ],
        ),
        compiler_params=pltpu.CompilerParams(
            dimension_semantics=("parallel", "parallel", "arbitrary"),
        ),
        cost_estimate=pl.CostEstimate(
            flops=flops,
            transcendentals=num_heads * S * S // 2,
            bytes_accessed=bytes_accessed,
        ),
    )(qkv, qkv, qkv)


# ---------------------------------------------------------------------------
# Module
# ---------------------------------------------------------------------------
class GPT2AttentionPallas:
    """JAX/Pallas port of vLLM GPT2Attention (tp_world_size = 1, prefill path)."""

    def __init__(self, hidden_size, num_heads, key, dtype=jnp.bfloat16):
        assert hidden_size % num_heads == 0
        self.hidden_size = hidden_size
        self.num_heads = num_heads
        self.head_dim = hidden_size // num_heads
        self.scale = self.head_dim ** -0.5
        self.dtype = dtype
        H = hidden_size
        k1, k2, k3, k4 = jax.random.split(key, 4)
        s = 0.02
        # Nominal (unscaled) parameters — the module's weights.
        self.w_cattn = (jax.random.normal(k1, (H, 3 * H)) * s).astype(dtype)
        self.b_cattn = (jax.random.normal(k2, (3 * H,)) * s).astype(dtype)
        self.w_cproj = (jax.random.normal(k3, (H, H)) * s).astype(dtype)
        self.b_cproj = (jax.random.normal(k4, (H,)) * s).astype(dtype)
        # Fold the softmax scale into the Q columns of c_attn once at init so
        # the attention hot loop does zero scaling work (neither on the
        # (tq, tkv) score tile nor on q).
        col_scale = jnp.concatenate([jnp.full((H,), self.scale, jnp.float32),
                                     jnp.ones((2 * H,), jnp.float32)])
        self.w_cattn_folded = (self.w_cattn.astype(jnp.float32)
                               * col_scale).astype(dtype)
        self.b_cattn_folded = (self.b_cattn.astype(jnp.float32)
                               * col_scale).astype(dtype)

    def __call__(self, hidden_states, kv_cache=None):
        # TODO(synk): paged KV-cache read/write + decode path not implemented;
        #             this is the prefill (causal self-attention) path.
        qkv = linear_bias(hidden_states, self.w_cattn_folded,
                          self.b_cattn_folded)                      # [S, 3H]
        attn = causal_attention_from_qkv(qkv, self.num_heads, self.head_dim,
                                         hidden_states.dtype)       # [S, H]
        out = linear_bias(attn, self.w_cproj, self.b_cproj)          # [S, H]
        return out


# ---------------------------------------------------------------------------
# Pure-JAX (f32) reference for a sanity check
# ---------------------------------------------------------------------------
def reference_forward(mod, x):
    x = x.astype(jnp.float32)
    w_cattn = mod.w_cattn.astype(jnp.float32)
    b_cattn = mod.b_cattn.astype(jnp.float32)
    w_cproj = mod.w_cproj.astype(jnp.float32)
    b_cproj = mod.b_cproj.astype(jnp.float32)
    qkv = x @ w_cattn + b_cattn
    q, k, v = jnp.split(qkv, 3, axis=-1)
    S = x.shape[0]
    qh = q.reshape(S, mod.num_heads, mod.head_dim).transpose(1, 0, 2)
    kh = k.reshape(S, mod.num_heads, mod.head_dim).transpose(1, 0, 2)
    vh = v.reshape(S, mod.num_heads, mod.head_dim).transpose(1, 0, 2)
    s = jnp.einsum("hqd,hkd->hqk", qh, kh) * mod.scale
    mask = jnp.tril(jnp.ones((S, S), bool))
    s = jnp.where(mask[None], s, -jnp.inf)
    p = jax.nn.softmax(s, axis=-1)
    o = jnp.einsum("hqk,hkd->hqd", p, vh).transpose(1, 0, 2).reshape(S, -1)
    return o @ w_cproj + b_cproj


if __name__ == "__main__":
    key = jax.random.PRNGKey(0)
    k_param, k_in = jax.random.split(key)

    # Small but TPU-aligned shapes: H = 256 (lane-multiple), head_dim = 64
    # (=> 2 heads per lane-aligned group, 2 groups), S = 512 so both the q and
    # kv grid axes have multiple tiles and the causal DMA clamp + band/full
    # tile split are exercised.
    seq_len = 512
    hidden_size = 256
    num_heads = 4

    module = GPT2AttentionPallas(hidden_size, num_heads, k_param,
                                 dtype=jnp.bfloat16)
    hidden_states = jax.random.normal(
        k_in, (seq_len, hidden_size), jnp.float32).astype(jnp.bfloat16)

    out = jax.block_until_ready(module(hidden_states))
    assert out.shape == (seq_len, hidden_size)
    assert out.dtype == jnp.bfloat16

    ref = reference_forward(module, hidden_states)
    out_f32 = out.astype(jnp.float32)
    max_err = float(jnp.max(jnp.abs(out_f32 - ref)))
    assert jnp.allclose(out_f32, ref, atol=3e-2, rtol=3e-2), \
        f"mismatch vs reference (max abs err {max_err})"

    print("KERNEL_OK")
</pallas_src>

<mosaic_0001>
module attributes {stable_mosaic.version = 11 : i64} {
  func.func @linear_bias_kernel(%arg0: i32, %arg1: i32, %arg2: i32, %arg3: memref<512x256xbf16, #tpu.memory_space<vmem>>, %arg4: memref<256x384xbf16, #tpu.memory_space<vmem>>, %arg5: memref<1x384xbf16, #tpu.memory_space<vmem>>, %arg6: memref<512x384xbf16, #tpu.memory_space<vmem>>, %arg7: memref<512x384xf32, #tpu.memory_space<vmem>>) attributes {dimension_semantics = [#tpu.dimension_semantics<parallel>, #tpu.dimension_semantics<parallel>, #tpu.dimension_semantics<arbitrary>], iteration_bounds = array<i64: 1, 2, 1>, scalar_prefetch = 0 : i64, scratch_operands = 1 : i64, tpu.core_type = #tpu.core_type<tc>, window_params = [{transform_indices = @transform_0, window_bounds = array<i64: 512, 256>}, {transform_indices = @transform_1, window_bounds = array<i64: 256, 384>}, {transform_indices = @transform_2, window_bounds = array<i64: 1, 384>}, {transform_indices = @transform_3, window_bounds = array<i64: 512, 384>}]} {
    %c0_i32 = arith.constant 0 : i32
    %0 = arith.cmpi eq, %arg2, %c0_i32 : i32
    %1 = arith.extui %0 : i1 to i32
    %c0_i32_0 = arith.constant 0 : i32
    %2 = arith.cmpi ne, %1, %c0_i32_0 : i32
    scf.if %2 {
      %cst_10 = arith.constant 0.000000e+00 : f32
      %12 = vector.broadcast %cst_10 : f32 to vector<512x384xf32>
      %c0_11 = arith.constant 0 : index
      %c0_12 = arith.constant 0 : index
      %13 = vector.load %arg7[%c0_11, %c0_12] : memref<512x384xf32, #tpu.memory_space<vmem>>, vector<512x384xf32>
      tpu.vector_store %arg7[%c0_11, %c0_12], %12 {strides = array<i32>} : memref<512x384xf32, #tpu.memory_space<vmem>>, vector<512x384xf32>,
    } else {
    }
    %c0 = arith.constant 0 : index
    %c0_1 = arith.constant 0 : index
    %3 = vector.load %arg7[%c0, %c0_1] : memref<512x384xf32, #tpu.memory_space<vmem>>, vector<512x384xf32>
    %c0_2 = arith.constant 0 : index
    %c0_3 = arith.constant 0 : index
    %4 = vector.load %arg3[%c0_2, %c0_3] : memref<512x256xbf16, #tpu.memory_space<vmem>>, vector<512x256xbf16>
    %c0_4 = arith.constant 0 : index
    %c0_5 = arith.constant 0 : index
    %5 = vector.load %arg4[%c0_4, %c0_5] : memref<256x384xbf16, #tpu.memory_space<vmem>>, vector<256x384xbf16>
    %cst = arith.constant dense<0.000000e+00> : vector<512x384xf32>
    %6 = tpu.matmul %4, %5, %cst {dimension_numbers = #tpu.dot_dimension_numbers<[1], [0], [0], [1], [0, 0, 1, 1], [], []>} : vector<512x256xbf16>, vector<256x384xbf16>, vector<512x384xf32> -> vector<512x384xf32>
    %7 = arith.addf %3, %6 : vector<512x384xf32>
    %c0_6 = arith.constant 0 : index
    %c0_7 = arith.constant 0 : index
    %8 = vector.load %arg7[%c0_6, %c0_7] : memref<512x384xf32, #tpu.memory_space<vmem>>, vector<512x384xf32>
    tpu.vector_store %arg7[%c0_6, %c0_7], %7 {strides = array<i32>} : memref<512x384xf32, #tpu.memory_space<vmem>>, vector<512x384xf32>,
    %c0_i32_8 = arith.constant 0 : i32
    %9 = arith.cmpi eq, %arg2, %c0_i32_8 : i32
    %10 = arith.extui %9 : i1 to i32
    %c0_i32_9 = arith.constant 0 : i32
    %11 = arith.cmpi ne, %10, %c0_i32_9 : i32
    scf.if %11 {
      %c0_10 = arith.constant 0 : index
      %c0_11 = arith.constant 0 : index
      %12 = vector.load %arg7[%c0_10, %c0_11] : memref<512x384xf32, #tpu.memory_space<vmem>>, vector<512x384xf32>
      %c0_12 = arith.constant 0 : index
      %c0_13 = arith.constant 0 : index
      %13 = vector.load %arg5[%c0_12, %c0_13] : memref<1x384xbf16, #tpu.memory_space<vmem>>, vector<1x384xbf16>
      %14 = arith.extf %13 : vector<1x384xbf16> to vector<1x384xf32>
      %15 = vector.broadcast %14 : vector<1x384xf32> to vector<512x384xf32>
      %16 = arith.addf %12, %15 : vector<512x384xf32>
      %17 = arith.truncf %16 : vector<512x384xf32> to vector<512x384xbf16>
      %c0_14 = arith.constant 0 : index
      %c0_15 = arith.constant 0 : index
      %18 = vector.load %arg6[%c0_14, %c0_15] : memref<512x384xbf16, #tpu.memory_space<vmem>>, vector<512x384xbf16>
      tpu.vector_store %arg6[%c0_14, %c0_15], %17 {strides = array<i32>} : memref<512x384xbf16, #tpu.memory_space<vmem>>, vector<512x384xbf16>,
    } else {
    }
    return
  }
  func.func @transform_0(%arg0: i32, %arg1: i32, %arg2: i32) -> (i32, i32) {
    %c0_i32 = arith.constant 0 : i32
    return %arg0, %arg2 : i32, i32
  }
  func.func @transform_1(%arg0: i32, %arg1: i32, %arg2: i32) -> (i32, i32) {
    %c0_i32 = arith.constant 0 : i32
    return %arg2, %arg1 : i32, i32
  }
  func.func @transform_2(%arg0: i32, %arg1: i32, %arg2: i32) -> (i32, i32) {
    %c0_i32 = arith.constant 0 : i32
    %c0_i32_0 = arith.constant 0 : i32
    return %c0_i32, %arg1 : i32, i32
  }
  func.func @transform_3(%arg0: i32, %arg1: i32, %arg2: i32) -> (i32, i32) {
    %c0_i32 = arith.constant 0 : i32
    return %arg0, %arg1 : i32, i32
  }
}

</mosaic_0001>

<bundles_post_ra>
// kernel: tpu_custom_call.1
= control target key start
LH: loop header
LB: loop body
LE: loop exit
PB: predicated region body
PF: predicated region fallthrough
CT: control target
= control target key end

     0   :  { %8 = vsyncpa [#allocation4], 0  ;;  %s5137_s0 = inlined_call_operand.hbm [shape: bf16[512,256], index: 0, kind: input, shape index: {}]   ;;  %s5138_s1 = inlined_call_operand.hbm [shape: bf16[256,768], index: 1, kind: input, shape index: {}]   ;;  %s5139_s2 = inlined_call_operand.vmem [shape: bf16[1,768], index: 2, kind: input, shape index: {}]   ;;  %s5140_s3 = inlined_call_operand.hbm [shape: bf16[512,768], index: 3, kind: output, shape index: {}]  }
   0x1   :  { %9 = vsyncpa [#allocation7], 0 }
   0x2   :  { %11 = vsyncpa [#allocation7 + $0x1], 0 }
   0x3   :  { %12 = vsyncpa [#allocation5], 0 }
   0x4   :  { %14 = vsyncpa [#allocation5 + $0x1], 0  ;;  %s4509_s12 = smov 0   ;;  %s4511_s13 = smov 0  }
   0x5   :  { %s4513_s14 = smov 0   ;;  %s4515_s15 = smov 0  }
   0x6   :  { %s4517_s16 = smov 0   ;;  %s4519_s17 = smov 0  }
   0x7 LB: > { %s3705_s18 = sadd.s32 4294967295, %s4475_s17   ;;  %s3706_s19 = sadd.s32 4294967294, %s4475_s17   ;;  %s4475_s17 = sphi %s4519_s17, %s20_s17   ;;  %s4471_s16 = sphi %s4517_s16, %s5169_s16   ;;  %s4467_s15 = sphi %s4515_s15, %s5168_s15   ;;  %s4463_s14 = sphi %s4513_s14, %s5167_s14   ;;  %s4459_s13 = sphi %s4511_s13, %s5166_s13   ;;  %s4455_s12 = sphi %s4509_s12, %s5165_s12  }
   0x8   : > { %p83_p0 = scmp.ne.s32.totalorder %s4463_s14, %s4459_s13  ;;  %p84_p1 = scmp.eq.s32.totalorder %s4475_s17, 0 }
   0x9   : > { %p89_p2 = scmp.ne.s32.totalorder %s4459_s13, %s4455_s12  ;;  %p4547_p3 = scmp.eq.s32.totalorder %s3705_s18, 0 }
   0xa   : > { %p141_p4 = scmp.eq.s32.totalorder %s3705_s18, 1  ;;  %p4551_p5 = por %p84_p1, %p83_p0 }
   0xb   : > { %s5147_s21 = scalar_select %p4547_p3, 1, 0 }
   0xc   : > { %p147_p6 = scmp.eq.s32.totalorder %s3706_s19, 1  ;;  %p4557_p7 = por %p4547_p3, %p89_p2 }
   0xd   : > { %p4561_p8 = por %p141_p4, %p83_p0  ;;  %p3707_p10 = scmp.ge.s32.totalorder %s4475_s17, 1 }
   0xe   : > { %s5149_s23 = scalar_select %p4557_p7, 1, 0 }
   0xf   : > { %s5150_s24 = scalar_select %p4561_p8, 1, 0 }
  0x10   : > { %p4565_p9 = por %p147_p6, %p89_p2  ;;  %p154_p11 = scmp.lt.s32.totalorder %s4475_s17, 3 }
  0x11   : > { %s4477_s27 = smov [#allocation3]   ;;  %p4110_p1 = scmp.lt.s32.totalorder %s4475_s17, 2 }
  0x12   : > { %s5151_s25 = scalar_select %p4565_p9, 1, 0 }
  0x13   : > { %p4571_p12 = pnand %p3707_p10, %p154_p11  ;;  %s172_s28 = sshll.u32 %s4477_s27, 4  ;;  %s4575_s28 = int_to_ptr.vmem [resolvable:$true] %s172_s28 }
  0x14   : > { %p4589_p4 = pnand %p4110_p1, %p4551_p5  ;;  %s35_s4 = sadd.s32 1, %s4471_s16 }
  0x15   : > { %s5152_s26 = scalar_select %p4571_p12, 1, 0 }
  0x16   : > { %p4097_p13 = pneg %p4571_p12  ;;  %p4594_p6 = scmp.ge.s32.totalorder %s35_s4, 2 }
  0x17   : > { %s5154_s30 = scalar_select %p4589_p4, 1, 0 }
  0x18   : > { %p4583_p2 = pnand %p4097_p13, %p4547_p3  ;;  %s4331_s8 = scalar_lea.hbm %s5137_s0, 8192 }
  0x19   : > { %s5155_s5 = scalar_select %p4594_p6, 1, 0 }
  0x1a   : > { %p4332_p10 = scmp.ne.s32.totalorder %s5137_s0, %s4331_s8  ;;  %p4333_p11 = pneg %p4583_p2 }
  0x1b   : > { %p4338_p1 = scmp.lt.u32.totalorder %s4331_s8, %s5137_s0 }
  0x1c   : > { %p4334_p13 = pnand %p4333_p11, %p4332_p10 }
  0x1e   : > { %p4335_p5 = pneg %p4334_p13 }
  0x20   : > { %p4340_p0 = pnand %p4338_p1, %p4335_p5 }
  0x22   : > { %4343 = shalt.err (!%p4340_p0)
}
  0x23   : > { %s4344_s19 = scalar_lea.vmem %s4575_s28, 8192  ;;  %p4352_p3 = scmp.lt.s32.totalorder %s4575_s28, %s4575_s28 }
  0x24   : > { %p4345_p9 = scmp.ne.s32.totalorder %s4575_s28, %s4344_s19  ;;  %p4353_p12 = scmp.lt.s32.totalorder %s4344_s19, %s4344_s19 }
  0x26   : > { %p4347_p8 = pnand %p4345_p9, %p4333_p11  ;;  %p4354_p4 = por %p4353_p12, %p4352_p3 }
  0x28   : > { %p4348_p7 = pneg %p4347_p8 }
  0x2a   : > { %p4355_p6 = pnand %p4354_p4, %p4348_p7 }
  0x2c   : > { %4358 = shalt.err (!%p4355_p6)
}
  0x2d   : > { %s4478_s22 = smov 128   ;;  %s4479_s27 = smov 8  }
  0x2e   : > { %4100 = dma.hbm_to_vmem [thread:$0]  (!%p4583_p2), %s5137_s0, 8192, %s4575_s28, [#allocation4], %s4478_s22, %s4478_s22, %s4479_s27  }
  0x2f   : > { %s186_s8 = sand.u32 1, %s4463_s14   ;;  %p5156_p3 = scmp.ne.s32.totalorder %s5155_s5, 0 }
  0x30   : > { %s4086_s9 = smul.u32 384, %s186_s8  ;;  %s5157_s22 = sadd.s32 1, %s4463_s14 }
  0x31   : > { %s5171_s4 = smov (%p5156_p3, %s35_s4), 0  ;;  %s3956_s11 = smul.u32 192, %s4471_s16 }
  0x32   : > { %s72_s10 = ssub.s32 %s4471_s16, %s5171_s4  ;;  %s190_s28 = scalar_lea.vmem [#allocation6], %s4086_s9 }
  0x33   : > { %p74_p7 = scmp.eq.s32.totalorder %s72_s10, 0  ;;  %s4630_s20 = scalar_lea.hbm %s5138_s1, %s3956_s11 }
  0x34   : > { %s200_s29 = sshll.u32 %s190_s28, 4  ;;  %s4639_s27 = scalar_lea.sflag [#allocation7], %s186_s8  ;;  %s4637_s29 = int_to_ptr.vmem [resolvable:$true] %s200_s29 }
  0x35   : > { %s4635_s5 = scalar_select %p74_p7, %s4463_s14, %s5157_s22  }
  0x36   : > { %s4359_s6 = scalar_lea.hbm %s4630_s20, 6144  ;;  %p5158_p9 = scmp.ne.s32.totalorder %s5154_s30, 0 }
  0x37   : > { %p4360_p8 = scmp.ne.s32.totalorder %s4630_s20, %s4359_s6  ;;  %s4364_s9 = scalar_lea.hbm %s5138_s1, 12288 }
  0x38   : > { %p4361_p12 = pneg %p5158_p9  ;;  %p4365_p4 = scmp.lt.u32.totalorder %s4630_s20, %s5138_s1 }
  0x39   : > { %p4366_p6 = scmp.lt.u32.totalorder %s4364_s9, %s4359_s6  ;;  %p4368_p11 = scmp.lt.u32.totalorder %s4359_s6, %s4630_s20 }
  0x3a   : > { %p4362_p0 = pnand %p4361_p12, %p4360_p8 }
  0x3b   : > { %p4367_p10 = por %p4366_p6, %p4365_p4 }
  0x3c   : > { %p4363_p2 = pneg %p4362_p0 }
  0x3d   : > { %p4369_p13 = por %p4368_p11, %p4367_p10 }
  0x3f   : > { %p4370_p5 = pnand %p4369_p13, %p4363_p2 }
  0x41   : > { %4373 = shalt.err (!%p4370_p5)
}
  0x42   : > { %s4374_s8 = scalar_lea.vmem %s4637_s29, 6144  ;;  %s4480_s19 = smov [#allocation6]  }
  0x43   : > { %p4375_p1 = scmp.ne.s32.totalorder %s4637_s29, %s4374_s8  ;;  %s4379_s28 = sshll.u32 %s4480_s19, 4  ;;  %s4380_s28 = int_to_ptr.vmem [resolvable:$false] %s4379_s28 }
  0x44   : > { %s4381_s22 = scalar_lea.vmem %s4380_s28, 12288  ;;  %p4382_p8 = scmp.lt.s32.totalorder %s4637_s29, %s4380_s28 }
  0x45   : > { %p4377_p3 = pnand %p4375_p1, %p4361_p12  ;;  %p4383_p0 = scmp.lt.s32.totalorder %s4381_s22, %s4374_s8 }
  0x47   : > { %p4378_p7 = pneg %p4377_p3  ;;  %p4384_p4 = por %p4383_p0, %p4382_p8 }
  0x49   : > { %p4385_p6 = pnand %p4384_p4, %p4378_p7 }
  0x4b   : > { %4388 = shalt.err (!%p4385_p6)
}
  0x4c   : > { %s4481_s6 = smov 384   ;;  %s4482_s7 = smov 192  }
  0x4d   : > { %s4483_s10 = smov 12   ;;  %p5159_p12 = scmp.ne.s32.totalorder %s5152_s26, 0 }
  0x4e   : > { %4104 = dma.hbm_to_vmem [thread:$0]  (!%p5158_p9), %s4630_s20, 6144, %s4637_s29, %s4639_s27, %s4481_s6, %s4482_s7, %s4483_s10  }
  0x4f   : > { %220 = sbr.rel (%p5159_p12) target bundleno = 640 (0x280), region = 32  ;;  %p5160_p2 = scmp.ne.s32.totalorder (!%p5159_p12), %s5147_s21, 0 }
  0x56   : > { %4442 = dma.done.wait (%p5160_p2), [#allocation4], 8192  }
  0x57   : > { %4444 = vsyncadd (%p5160_p2), [#allocation4], 4294959104  ;;  %s4674_s9 = sand.u32 1, %s4459_s13   ;;  %p5161_p9 = scmp.ne.s32.totalorder %s5149_s23, 0 }
  0x58   : > { %s4087_s11 = smul.u32 384, %s4674_s9  ;;  %s227_s18 = scalar_lea.sflag [#allocation7], %s4674_s9 }
  0x5a   : > { %s4678_s8 = scalar_lea.vmem [#allocation6], %s4087_s11 }
  0x5b   : > { %4446 = dma.done.wait (%p5161_p9), %s227_s18, 6144  }
  0x5c   : > { %4448 = vsyncadd (%p5161_p9), %s227_s18, 4294961152  ;;  %v4484_v0 = vmov 0   ;;  %v4171_v1 = vld [vmem:[%s4678_s8 + $0x4] ss:$12 sps:$4 sm:$0xff]   ;;  %v4173_v2 = vld [vmem:[%s4678_s8 + $0x8] ss:$12 sps:$4 sm:$0xff]  }
  0x5d   : > { %1714 = vmatprep.subr.bf16.mxu1 %v4484_v0  ;;  %1361 = vmatprep.subr.bf16.mxu0 %v4171_v1  ;;  %v4174_v3 = vld [vmem:[%s4678_s8] ss:$12 sps:$4 sm:$0xff]   ;;  %v4175_v4 = vld [vmem:[%s4678_s8 + $0x1c] ss:$12 sps:$4 sm:$0xff]   ;;  %v4178_v6 = vld [vmem:[%s4678_s8 + $0x18] ss:$12 sps:$4 sm:$0xff]  }
  0x5e   : > { %1715 = vmatpush1.bf16.msra.mxu1 %v4173_v2  ;;  %1362 = vmatpush1.bf16.msra.mxu0 %v4174_v3  ;;  %v4177_v5 = vld [vmem:[%s4678_s8 + $0x20] ss:$12 sps:$4 sm:$0xff]   ;;  %v4181_v8 = vld [vmem:[%s4678_s8 + $0x38] ss:$12 sps:$4 sm:$0xff]   ;;  %v4182_v9 = vld [vmem:[%s4678_s8 + $0x30] ss:$12 sps:$4 sm:$0xff]  }
  0x5f   : > { %1716 = vmatprep.subr.bf16.mxu1 %v4484_v0  ;;  %1363 = vmatprep.subr.bf16.mxu0 %v4175_v4  ;;  %v4179_v7 = vld [vmem:[%s4678_s8 + $0x34] ss:$12 sps:$4 sm:$0xff]   ;;  %v4183_v10 = vld [vmem:[%s4678_s8 + $0x4c] ss:$12 sps:$4 sm:$0xff]   ;;  %v4185_v11 = vld [vmem:[%s4678_s8 + $0x50] ss:$12 sps:$4 sm:$0xff]  }
  0x60   : > { %v4186_v12 = vld [vmem:[%s4678_s8 + $0x48] ss:$12 sps:$4 sm:$0xff]   ;;  %v4187_v13 = vld [vmem:[%s4678_s8 + $0x64] ss:$12 sps:$4 sm:$0xff]   ;;  %v4190_v15 = vld [vmem:[%s4678_s8 + $0x60] ss:$12 sps:$4 sm:$0xff]  }
  0x61   : > { %v4189_v14 = vld [vmem:[%s4678_s8 + $0x68] ss:$12 sps:$4 sm:$0xff]   ;;  %v4193_v17 = vld [vmem:[%s4678_s8 + $0x80] ss:$12 sps:$4 sm:$0xff]   ;;  %v4194_v18 = vld [vmem:[%s4678_s8 + $0x78] ss:$12 sps:$4 sm:$0xff]  }
  0x62   : > { %1717 = vmatpush1.bf16.msra.mxu1 %v4177_v5  ;;  %1364 = vmatpush1.bf16.msra.mxu0 %v4178_v6  ;;  %v4191_v16 = vld [vmem:[%s4678_s8 + $0x7c] ss:$12 sps:$4 sm:$0xff]   ;;  %v4195_v19 = vld [vmem:[%s4678_s8 + $0x94] ss:$12 sps:$4 sm:$0xff]   ;;  %v4197_v20 = vld [vmem:[%s4678_s8 + $0x98] ss:$12 sps:$4 sm:$0xff]  }
  0x63   : > { %1718 = vmatprep.subr.bf16.mxu1 %v4484_v0  ;;  %1365 = vmatprep.subr.bf16.mxu0 %v4179_v7  ;;  %v4198_v21 = vld [vmem:[%s4678_s8 + $0x90] ss:$12 sps:$4 sm:$0xff]   ;;  %v4199_v22 = vld [vmem:[%s4678_s8 + $0xac] ss:$12 sps:$4 sm:$0xff]   ;;  %v4202_v24 = vld [vmem:[%s4678_s8 + $0xa8] ss:$12 sps:$4 sm:$0xff]  }
  0x64   : > { %v4201_v23 = vld [vmem:[%s4678_s8 + $0xb0] ss:$12 sps:$4 sm:$0xff]   ;;  %v4205_v26 = vld [vmem:[%s4678_s8 + $0xc8] ss:$12 sps:$4 sm:$0xff]   ;;  %v4206_v27 = vld [vmem:[%s4678_s8 + $0xc0] ss:$12 sps:$4 sm:$0xff]  }
  0x65   : > { %v4203_v25 = vld [vmem:[%s4678_s8 + $0xc4] ss:$12 sps:$4 sm:$0xff]   ;;  %v4207_v28 = vld [vmem:[%s4678_s8 + $0xdc] ss:$12 sps:$4 sm:$0xff]   ;;  %v4209_v29 = vld [vmem:[%s4678_s8 + $0xe0] ss:$12 sps:$4 sm:$0xff]  }
  0x66   : > { %1719 = vmatpush1.bf16.msra.mxu1 %v4181_v8  ;;  %1366 = vmatpush1.bf16.msra.mxu0 %v4182_v9  ;;  %v4210_v30 = vld [vmem:[%s4678_s8 + $0xd8] ss:$12 sps:$4 sm:$0xff]   ;;  %v4211_v31 = vld [vmem:[%s4678_s8 + $0xf4] ss:$12 sps:$4 sm:$0xff]   ;;  %v4214_v34 = vld [vmem:[%s4678_s8 + $0xf0] ss:$12 sps:$4 sm:$0xff]  }
  0x67   : > { %1720 = vmatprep.subr.bf16.mxu1 %v4484_v0  ;;  %1367 = vmatprep.subr.bf16.mxu0 %v4183_v10  ;;  %v4237_v32 = vld [vmem:[#allocation3 + $0x4] ss:$8 sps:$4 sm:$0xff]   ;;  %v4217_v36 = vld [vmem:[%s4678_s8 + $0x110] ss:$12 sps:$4 sm:$0xff]   ;;  %v4218_v37 = vld [vmem:[%s4678_s8 + $0x108] ss:$12 sps:$4 sm:$0xff]  }
  0x68   : > { %v4213_v33 = vld [vmem:[%s4678_s8 + $0xf8] ss:$12 sps:$4 sm:$0xff]   ;;  %1746 = vmatprep.mubr.bf16.mxu1 %v4237_v32  ;;  %1393 = vmatprep.mubr.bf16.mxu0 %v4237_v32  ;;  %v4221_v39 = vld [vmem:[%s4678_s8 + $0x128] ss:$12 sps:$4 sm:$0xff]   ;;  %v4222_v40 = vld [vmem:[%s4678_s8 + $0x120] ss:$12 sps:$4 sm:$0xff]  }
  0x69   : > { %v4215_v35 = vld [vmem:[%s4678_s8 + $0x10c] ss:$12 sps:$4 sm:$0xff]   ;;  %v4219_v38 = vld [vmem:[%s4678_s8 + $0x124] ss:$12 sps:$4 sm:$0xff]   ;;  %v4223_v41 = vld [vmem:[%s4678_s8 + $0x13c] ss:$12 sps:$4 sm:$0xff]  }
  0x6a   : > { %1721 = vmatpush1.bf16.msra.mxu1 %v4185_v11  ;;  %1368 = vmatpush1.bf16.msra.mxu0 %v4186_v12  ;;  %v4225_v42 = vld [vmem:[%s4678_s8 + $0x140] ss:$12 sps:$4 sm:$0xff]   ;;  %v4226_v43 = vld [vmem:[%s4678_s8 + $0x138] ss:$12 sps:$4 sm:$0xff]   ;;  %v4230_v46 = vld [vmem:[%s4678_s8 + $0x150] ss:$12 sps:$4 sm:$0xff]  }
  0x6b   : > { %1722 = vmatprep.subr.bf16.mxu1 %v4484_v0  ;;  %1369 = vmatprep.subr.bf16.mxu0 %v4187_v13  ;;  %v4227_v44 = vld [vmem:[%s4678_s8 + $0x154] ss:$12 sps:$4 sm:$0xff]   ;;  %v4229_v45 = vld [vmem:[%s4678_s8 + $0x158] ss:$12 sps:$4 sm:$0xff]   ;;  %v4233_v48 = vld [vmem:[%s4678_s8 + $0x170] ss:$12 sps:$4 sm:$0xff]  }
  0x6c   : > { %v4231_v47 = vld [vmem:[%s4678_s8 + $0x16c] ss:$12 sps:$4 sm:$0xff]   ;;  %v4234_v49 = vld [vmem:[%s4678_s8 + $0x168] ss:$12 sps:$4 sm:$0xff]   ;;  %s261_s20 = smul.u32 3, %s4467_s15  ;;  %s3573_s6 = scalar_lea.sflag [#allocation5], %s4674_s9 }
  0x6d   : > { %v4235_v50 = vld [vmem:[#allocation3] ss:$8 sps:$4 sm:$0xff]   ;;  %v4238_v51 = vld [vmem:[#allocation3 + $0x14] ss:$8 sps:$4 sm:$0xff]   ;;  %v4240_v52 = vld [vmem:[#allocation3 + $0x10] ss:$8 sps:$4 sm:$0xff]  }
  0x6e   : > { %1723 = vmatpush1.bf16.msra.mxu1 %v4189_v14  ;;  %1370 = vmatpush1.bf16.msra.mxu0 %v4190_v15  ;;  %v4241_v53 = vld [vmem:[#allocation3 + $0x24] ss:$8 sps:$4 sm:$0xff]   ;;  %v4243_v54 = vld [vmem:[#allocation3 + $0x20] ss:$8 sps:$4 sm:$0xff]   ;;  %v4244_v55 = vld [vmem:[#allocation3 + $0x34] ss:$8 sps:$4 sm:$0xff]  }
  0x6f   : > { %1724 = vmatprep.subr.bf16.mxu1 %v4484_v0  ;;  %1371 = vmatprep.subr.bf16.mxu0 %v4191_v16  ;;  %v4246_v56 = vld [vmem:[#allocation3 + $0x30] ss:$8 sps:$4 sm:$0xff]   ;;  %v4247_v57 = vld [vmem:[#allocation3 + $0x44] ss:$8 sps:$4 sm:$0xff]   ;;  %v4249_v58 = vld [vmem:[#allocation3 + $0x40] ss:$8 sps:$4 sm:$0xff]  }
  0x70   : > { %v4250_v59 = vld [vmem:[#allocation3 + $0x54] ss:$8 sps:$4 sm:$0xff]   ;;  %v4252_v60 = vld [vmem:[#allocation3 + $0x50] ss:$8 sps:$4 sm:$0xff]   ;;  %v4253_v61 = vld [vmem:[#allocation3 + $0x64] ss:$8 sps:$4 sm:$0xff]  }
  0x71   : > { %v4255_v62 = vld [vmem:[#allocation3 + $0x60] ss:$8 sps:$4 sm:$0xff]   ;;  %v4256_v63 = vld [vmem:[#allocation3 + $0x74] ss:$8 sps:$4 sm:$0xff]   ;;  %v4259_v1 = vld [vmem:[#allocation3 + $0x84] ss:$8 sps:$4 sm:$0xff]  }
  0x72   : > { %1725 = vmatpush1.bf16.msra.mxu1 %v4193_v17  ;;  %1372 = vmatpush1.bf16.msra.mxu0 %v4194_v18  ;;  %v4261_v2 = vld [vmem:[#allocation3 + $0x80] ss:$8 sps:$4 sm:$0xff]   ;;  %v4262_v3 = vld [vmem:[#allocation3 + $0x94] ss:$8 sps:$4 sm:$0xff]   ;;  %v4264_v4 = vld [vmem:[#allocation3 + $0x90] ss:$8 sps:$4 sm:$0xff]  }
  0x73   : > { %1726 = vmatprep.subr.bf16.mxu1 %v4484_v0  ;;  %1373 = vmatprep.subr.bf16.mxu0 %v4195_v19  ;;  %v4265_v5 = vld [vmem:[#allocation3 + $0xa4] ss:$8 sps:$4 sm:$0xff]   ;;  %v4267_v6 = vld [vmem:[#allocation3 + $0xa0] ss:$8 sps:$4 sm:$0xff]   ;;  %v4268_v7 = vld [vmem:[#allocation3 + $0xb4] ss:$8 sps:$4 sm:$0xff]  }
  0x74   : > { %v4270_v8 = vld [vmem:[#allocation3 + $0xb0] ss:$8 sps:$4 sm:$0xff]   ;;  %v4271_v9 = vld [vmem:[#allocation3 + $0xc4] ss:$8 sps:$4 sm:$0xff]   ;;  %v4273_v10 = vld [vmem:[#allocation3 + $0xc0] ss:$8 sps:$4 sm:$0xff]  }
  0x75   : > { %v4274_v11 = vld [vmem:[#allocation3 + $0xd4] ss:$8 sps:$4 sm:$0xff]   ;;  %v4276_v12 = vld [vmem:[#allocation3 + $0xd0] ss:$8 sps:$4 sm:$0xff]   ;;  %v4277_v13 = vld [vmem:[#allocation3 + $0xe4] ss:$8 sps:$4 sm:$0xff]  }
  0x76   : > { %1727 = vmatpush1.bf16.msra.mxu1 %v4197_v20  ;;  %1374 = vmatpush1.bf16.msra.mxu0 %v4198_v21  ;;  %v4279_v14 = vld [vmem:[#allocation3 + $0xe0] ss:$8 sps:$4 sm:$0xff]   ;;  %v4280_v15 = vld [vmem:[#allocation3 + $0xf4] ss:$8 sps:$4 sm:$0xff]   ;;  %v4282_v16 = vld [vmem:[#allocation3 + $0xf0] ss:$8 sps:$4 sm:$0xff]  }
  0x77   : > { %1728 = vmatprep.subr.bf16.mxu1 %v4484_v0  ;;  %1375 = vmatprep.subr.bf16.mxu0 %v4199_v22  ;;  %v4283_v17 = vld [vmem:[#allocation3 + $0x104] ss:$8 sps:$4 sm:$0xff]   ;;  %v4285_v18 = vld [vmem:[#allocation3 + $0x100] ss:$8 sps:$4 sm:$0xff]   ;;  %v4286_v19 = vld [vmem:[#allocation3 + $0x114] ss:$8 sps:$4 sm:$0xff]  }
  0x78   : > { %v4288_v20 = vld [vmem:[#allocation3 + $0x110] ss:$8 sps:$4 sm:$0xff]   ;;  %v4289_v21 = vld [vmem:[#allocation3 + $0x124] ss:$8 sps:$4 sm:$0xff]   ;;  %v4291_v22 = vld [vmem:[#allocation3 + $0x120] ss:$8 sps:$4 sm:$0xff]  }
  0x79   : > { %v4306_v32 = vld [vmem:[#allocation3 + $0x170] ss:$8 sps:$4 sm:$0xff]   ;;  %p262_p10 = scmp.lt.s32.totalorder %s261_s20, 5  ;;  %s4088_s30 = smul.u32 768, %s4674_s9 }
  0x7a   : > { %1729 = vmatpush1.bf16.msra.mxu1 %v4201_v23  ;;  %1376 = vmatpush1.bf16.msra.mxu0 %v4202_v24  ;;  %v4292_v23 = vld [vmem:[#allocation3 + $0x134] ss:$8 sps:$4 sm:$0xff]   ;;  %v4294_v24 = vld [vmem:[#allocation3 + $0x130] ss:$8 sps:$4 sm:$0xff]   ;;  %s4085_s27 = smul.u32 192, %s4467_s15  ;;  %p5162_p13 = scmp.ne.s32.totalorder %s5150_s24, 0 }
  0x7b   : > { %1730 = vmatprep.subr.bf16.mxu1 %v4484_v0  ;;  %1377 = vmatprep.subr.bf16.mxu0 %v4203_v25  ;;  %v4295_v25 = vld [vmem:[#allocation3 + $0x144] ss:$8 sps:$4 sm:$0xff]   ;;  %s5173_s20 = smov (!%p262_p10, %s261_s20), 5  ;;  %s4764_s29 = scalar_lea.vmem [#allocation8], %s4088_s30 }
  0x7c   : > { %s264_s26 = scalar_lea.vmem %s5139_s2, %s5173_s20  ;;  %s3589_s19 = sshll.u32 %s4764_s29, 4  ;;  %s5085_s19 = int_to_ptr.vmem [resolvable:$true] %s3589_s19 }
  0x7d   : > { %s5083_s22 = scalar_lea.hbm %s5140_s3, %s4085_s27  ;;  %s4389_s7 = scalar_lea.vmem %s5085_s19, 12288 }
  0x7e   : > { %1731 = vmatpush1.bf16.msra.mxu1 %v4205_v26  ;;  %1378 = vmatpush1.bf16.msra.mxu0 %v4206_v27  ;;  %v4297_v26 = vld [vmem:[#allocation3 + $0x140] ss:$8 sps:$4 sm:$0xff]   ;;  %v4298_v27 = vld [vmem:[#allocation3 + $0x154] ss:$8 sps:$4 sm:$0xff]   ;;  %p4390_p11 = scmp.ne.s32.totalorder %s5085_s19, %s4389_s7  ;;  %s4485_s10 = smov [#allocation8]  }
  0x7f   : > { %1732 = vmatprep.subr.bf16.mxu1 %v4484_v0  ;;  %1379 = vmatprep.subr.bf16.mxu0 %v4207_v28  ;;  %v4300_v28 = vld [vmem:[#allocation3 + $0x150] ss:$8 sps:$4 sm:$0xff]   ;;  %s4393_s11 = sshll.u32 %s4485_s10, 4  ;;  %s4394_s11 = int_to_ptr.vmem [resolvable:$false] %s4393_s11 }
  0x80   : > { %p4391_p5 = pnand %p4390_p11, %p5162_p13  ;;  %s4395_s18 = scalar_lea.vmem %s4394_s11, 24576 }
  0x81   : > { %p4396_p3 = scmp.lt.s32.totalorder %s5085_s19, %s4394_s11  ;;  %p4397_p7 = scmp.lt.s32.totalorder %s4395_s18, %s4389_s7 }
  0x82   : > { %1733 = vmatpush1.bf16.msra.mxu1 %v4209_v29  ;;  %1380 = vmatpush1.bf16.msra.mxu0 %v4210_v30  ;;  %v4301_v29 = vld [vmem:[#allocation3 + $0x164] ss:$8 sps:$4 sm:$0xff]   ;;  %v4303_v30 = vld [vmem:[#allocation3 + $0x160] ss:$8 sps:$4 sm:$0xff]   ;;  %p4392_p1 = pneg %p4391_p5 }
  0x83   : > { %1734 = vmatprep.subr.bf16.mxu1 %v4484_v0  ;;  %1381 = vmatprep.subr.bf16.mxu0 %v4211_v31  ;;  %v4304_v31 = vld [vmem:[#allocation3 + $0x174] ss:$8 sps:$4 sm:$0xff]   ;;  %p4398_p8 = por %p4397_p7, %p4396_p3 }
  0x85   : > { %p4399_p0 = pnand %p4398_p8, %p4392_p1 }
  0x86   : > { %1735 = vmatpush1.bf16.msra.mxu1 %v4213_v33  ;;  %1382 = vmatpush1.bf16.msra.mxu0 %v4214_v34  ;;  %v4307_v33 = vld [vmem:[#allocation3 + $0x184] ss:$8 sps:$4 sm:$0xff]   ;;  %v4309_v34 = vld [vmem:[#allocation3 + $0x180] ss:$8 sps:$4 sm:$0xff]  }
  0x87   : > { %1736 = vmatprep.subr.bf16.mxu1 %v4484_v0  ;;  %1383 = vmatprep.subr.bf16.mxu0 %v4215_v35  ;;  %v4310_v35 = vld [vmem:[#allocation3 + $0x194] ss:$8 sps:$4 sm:$0xff]  }
  0x8a   : > { %1737 = vmatpush1.bf16.msra.mxu1 %v4217_v36  ;;  %1384 = vmatpush1.bf16.msra.mxu0 %v4218_v37  ;;  %v2585_v36 = vlaneseq  ;;  %v4312_v37 = vld [vmem:[#allocation3 + $0x190] ss:$8 sps:$4 sm:$0xff]  }
  0x8b   : > { %1738 = vmatprep.subr.bf16.mxu1 %v4484_v0  ;;  %1385 = vmatprep.subr.bf16.mxu0 %v4219_v38 }
  0x8c   : > { %v2586_v38 = vshrl.u32 %v2585_v36, 7 }
  0x8e   : > { %1739 = vmatpush1.bf16.msra.mxu1 %v4221_v39  ;;  %1386 = vmatpush1.bf16.msra.mxu0 %v4222_v40  ;;  %v4313_v39 = vld [vmem:[#allocation3 + $0x1a4] ss:$8 sps:$4 sm:$0xff]   ;;  %v2582_v40 = vld [vmem:[%s264_s26] sm:$0x7] }
  0x8f   : > { %1740 = vmatprep.subr.bf16.mxu1 %v4484_v0  ;;  %1387 = vmatprep.subr.bf16.mxu0 %v4223_v41  ;;  %v2583_v41 = vunpack.c.l.bf16 %v2582_v40 }
  0x92   : > { %1741 = vmatpush1.bf16.msra.mxu1 %v4225_v42  ;;  %1388 = vmatpush1.bf16.msra.mxu0 %v4226_v43  ;;  %v2595_v42 = vsub.s32 4, %v2586_v38  ;;  %v2587_v43 = vsub.s32 0, %v2586_v38 }
  0x93   : > { %1742 = vmatprep.subr.bf16.mxu1 %v4484_v0  ;;  %1389 = vmatprep.subr.bf16.mxu0 %v4227_v44  ;;  %v2591_v44 = vsub.s32 2, %v2586_v38 }
  0x96   : > { %1743 = vmatpush1.bf16.msra.mxu1 %v4229_v45  ;;  %1390 = vmatpush1.bf16.msra.mxu0 %v4230_v46  ;;  %v4315_v45 = vld [vmem:[#allocation3 + $0x1a0] ss:$8 sps:$4 sm:$0xff]   ;;  %v2596_v46 = vrot.slane %v2583_v41, %v2595_v42 }
  0x97   : > { %1744 = vmatprep.subr.bf16.mxu1 %v4484_v0  ;;  %1391 = vmatprep.subr.bf16.mxu0 %v4231_v47  ;;  %v4258_v0 = vld [vmem:[#allocation3 + $0x70] ss:$8 sps:$4 sm:$0xff]   ;;  %v2588_v47 = vrot.slane %v2583_v41, %v2587_v43 }
  0x9a   : > { %1745 = vmatpush1.bf16.msra.mxu1 %v4233_v48  ;;  %1392 = vmatpush1.bf16.msra.mxu0 %v4234_v49  ;;  %v4316_v48 = vld [vmem:[#allocation3 + $0x1b4] ss:$8 sps:$4 sm:$0xff]   ;;  %v2592_v49 = vrot.slane %v2583_v41, %v2591_v44 }
  0x9d   : > { %1747 = vmatmul.mubr.bf16.vlgmr.msra.gmra.mrb[0].mxu1 %v4235_v50  ;;  %1394 = vmatmul.mubr.bf16.vlgmr.msra.gmra.mrb[0].mxu0 %v4235_v50  ;;  %v4752_v50 = vrot.slane %v2596_v46, %v2587_v43 }
  0x9e   : > { %1754 = vmatprep.mubr.bf16.mxu1 %v4238_v51  ;;  %1403 = vmatprep.mubr.bf16.mxu0 %v4238_v51  ;;  %v4755_v51 = vrot.slane %v2588_v47, %v2587_v43 }
  0xa5   : > { %1755 = vmatmul.mubr.bf16.gmra.mrb[4].mxu1 %v4240_v52  ;;  %1404 = vmatmul.mubr.bf16.gmra.mrb[4].mxu0 %v4240_v52  ;;  %v4757_v52 = vrot.slane %v2592_v49, %v2587_v43 }
  0xa6   : > { %1762 = vmatprep.mubr.bf16.mxu1 %v4241_v53  ;;  %1413 = vmatprep.mubr.bf16.mxu0 %v4241_v53 }
  0xad   : > { %1763 = vmatmul.mubr.bf16.gmra.mrb[8].mxu1 %v4243_v54  ;;  %1414 = vmatmul.mubr.bf16.gmra.mrb[8].mxu0 %v4243_v54 }
  0xae   : > { %1770 = vmatprep.mubr.bf16.mxu1 %v4244_v55  ;;  %1423 = vmatprep.mubr.bf16.mxu0 %v4244_v55 }
  0xb5   : > { %1771 = vmatmul.mubr.bf16.gmra.mrb[12].mxu1 %v4246_v56  ;;  %1424 = vmatmul.mubr.bf16.gmra.mrb[12].mxu0 %v4246_v56 }
  0xb6   : > { %1778 = vmatprep.mubr.bf16.mxu1 %v4247_v57  ;;  %1433 = vmatprep.mubr.bf16.mxu0 %v4247_v57  ;;  %v4318_v57 = vld [vmem:[#allocation3 + $0x1b0] ss:$8 sps:$4 sm:$0xff]  }
  0xbd   : > { %1779 = vmatmul.mubr.bf16.gmra.mrb[16].mxu1 %v4249_v58  ;;  %1434 = vmatmul.mubr.bf16.gmra.mrb[16].mxu0 %v4249_v58 }
  0xbe   : > { %1786 = vmatprep.mubr.bf16.mxu1 %v4250_v59  ;;  %1443 = vmatprep.mubr.bf16.mxu0 %v4250_v59 }
  0xc5   : > { %1787 = vmatmul.mubr.bf16.gmra.mrb[20].mxu1 %v4252_v60  ;;  %1444 = vmatmul.mubr.bf16.gmra.mrb[20].mxu0 %v4252_v60 }
  0xc6   : > { %1794 = vmatprep.mubr.bf16.mxu1 %v4253_v61  ;;  %1453 = vmatprep.mubr.bf16.mxu0 %v4253_v61  ;;  %v4319_v61 = vld [vmem:[#allocation3 + $0x1c4] ss:$8 sps:$4 sm:$0xff]  }
  0xcd   : > { %1795 = vmatmul.mubr.bf16.gmra.mrb[24].mxu1 %v4255_v62  ;;  %1454 = vmatmul.mubr.bf16.gmra.mrb[24].mxu0 %v4255_v62 }
  0xce   : > { %1802 = vmatprep.mubr.bf16.mxu1 %v4256_v63  ;;  %1463 = vmatprep.mubr.bf16.mxu0 %v4256_v63 }
  0xd5   : > { %1803 = vmatmul.mubr.bf16.gmra.mrb[28].mxu1 %v4258_v0  ;;  %1464 = vmatmul.mubr.bf16.gmra.mrb[28].mxu0 %v4258_v0 }
  0xd6   : > { %1810 = vmatprep.mubr.bf16.mxu1 %v4259_v1  ;;  %1473 = vmatprep.mubr.bf16.mxu0 %v4259_v1 }
  0xdd   : > { %1811 = vmatmul.mubr.bf16.gmra.mrb[32].mxu1 %v4261_v2  ;;  %1474 = vmatmul.mubr.bf16.gmra.mrb[32].mxu0 %v4261_v2 }
  0xde   : > { %1818 = vmatprep.mubr.bf16.mxu1 %v4262_v3  ;;  %1483 = vmatprep.mubr.bf16.mxu0 %v4262_v3 }
  0xe5   : > { %1819 = vmatmul.mubr.bf16.gmra.mrb[36].mxu1 %v4264_v4  ;;  %1484 = vmatmul.mubr.bf16.gmra.mrb[36].mxu0 %v4264_v4 }
  0xe6   : > { %1826 = vmatprep.mubr.bf16.mxu1 %v4265_v5  ;;  %1493 = vmatprep.mubr.bf16.mxu0 %v4265_v5 }
  0xed   : > { %1827 = vmatmul.mubr.bf16.gmra.mrb[40].mxu1 %v4267_v6  ;;  %1494 = vmatmul.mubr.bf16.gmra.mrb[40].mxu0 %v4267_v6 }
  0xee   : > { %1834 = vmatprep.mubr.bf16.mxu1 %v4268_v7  ;;  %1503 = vmatprep.mubr.bf16.mxu0 %v4268_v7 }
  0xf5   : > { %1835 = vmatmul.mubr.bf16.gmra.mrb[44].mxu1 %v4270_v8  ;;  %1504 = vmatmul.mubr.bf16.gmra.mrb[44].mxu0 %v4270_v8 }
  0xf6   : > { %1842 = vmatprep.mubr.bf16.mxu1 %v4271_v9  ;;  %1513 = vmatprep.mubr.bf16.mxu0 %v4271_v9 }
  0xfd   : > { %1843 = vmatmul.mubr.bf16.gmra.mrb[48].mxu1 %v4273_v10  ;;  %1514 = vmatmul.mubr.bf16.gmra.mrb[48].mxu0 %v4273_v10 }
  0xfe   : > { %1850 = vmatprep.mubr.bf16.mxu1 %v4274_v11  ;;  %1523 = vmatprep.mubr.bf16.mxu0 %v4274_v11 }
 0x105   : > { %1851 = vmatmul.mubr.bf16.gmra.mrb[52].mxu1 %v4276_v12  ;;  %1524 = vmatmul.mubr.bf16.gmra.mrb[52].mxu0 %v4276_v12 }
 0x106   : > { %1858 = vmatprep.mubr.bf16.mxu1 %v4277_v13  ;;  %1533 = vmatprep.mubr.bf16.mxu0 %v4277_v13  ;;  %v4321_v13 = vld [vmem:[#allocation3 + $0x1c0] ss:$8 sps:$4 sm:$0xff]  }
 0x10d   : > { %1859 = vmatmul.mubr.bf16.gmra.mrb[56].mxu1 %v4279_v14  ;;  %1534 = vmatmul.mubr.bf16.gmra.mrb[56].mxu0 %v4279_v14 }
 0x10e   : > { %1866 = vmatprep.mubr.bf16.mxu1 %v4280_v15  ;;  %1543 = vmatprep.mubr.bf16.mxu0 %v4280_v15 }
 0x115   : > { %1867 = vmatmul.mubr.bf16.gmra.mrb[60].mxu1 %v4282_v16  ;;  %1544 = vmatmul.mubr.bf16.gmra.mrb[60].mxu0 %v4282_v16 }
 0x116   : > { %1874 = vmatprep.mubr.bf16.mxu1 %v4283_v17  ;;  %1553 = vmatprep.mubr.bf16.mxu0 %v4283_v17  ;;  %v4322_v17 = vld [vmem:[#allocation3 + $0x1d4] ss:$8 sps:$4 sm:$0xff]  }
 0x11d   : > { %1875 = vmatmul.mubr.bf16.gmra.mrb[64].mxu1 %v4285_v18  ;;  %1554 = vmatmul.mubr.bf16.gmra.mrb[64].mxu0 %v4285_v18 }
 0x11e   : > { %1882 = vmatprep.mubr.bf16.mxu1 %v4286_v19  ;;  %1563 = vmatprep.mubr.bf16.mxu0 %v4286_v19 }
 0x125   : > { %1883 = vmatmul.mubr.bf16.gmra.mrb[68].mxu1 %v4288_v20  ;;  %1564 = vmatmul.mubr.bf16.gmra.mrb[68].mxu0 %v4288_v20 }
 0x126   : > { %1890 = vmatprep.mubr.bf16.mxu1 %v4289_v21  ;;  %1573 = vmatprep.mubr.bf16.mxu0 %v4289_v21 }
 0x12d   : > { %1891 = vmatmul.mubr.bf16.gmra.mrb[72].mxu1 %v4291_v22  ;;  %1574 = vmatmul.mubr.bf16.gmra.mrb[72].mxu0 %v4291_v22 }
 0x12e   : > { %1898 = vmatprep.mubr.bf16.mxu1 %v4292_v23  ;;  %1583 = vmatprep.mubr.bf16.mxu0 %v4292_v23 }
 0x135   : > { %1899 = vmatmul.mubr.bf16.gmra.mrb[76].mxu1 %v4294_v24  ;;  %1584 = vmatmul.mubr.bf16.gmra.mrb[76].mxu0 %v4294_v24 }
 0x136   : > { %1906 = vmatprep.mubr.bf16.mxu1 %v4295_v25  ;;  %1593 = vmatprep.mubr.bf16.mxu0 %v4295_v25 }
 0x13d   : > { %1907 = vmatmul.mubr.bf16.gmra.mrb[80].mxu1 %v4297_v26  ;;  %1594 = vmatmul.mubr.bf16.gmra.mrb[80].mxu0 %v4297_v26 }
 0x13e   : > { %1914 = vmatprep.mubr.bf16.mxu1 %v4298_v27  ;;  %1603 = vmatprep.mubr.bf16.mxu0 %v4298_v27 }
 0x145   : > { %1915 = vmatmul.mubr.bf16.gmra.mrb[84].mxu1 %v4300_v28  ;;  %1604 = vmatmul.mubr.bf16.gmra.mrb[84].mxu0 %v4300_v28 }
 0x146   : > { %1922 = vmatprep.mubr.bf16.mxu1 %v4301_v29  ;;  %1613 = vmatprep.mubr.bf16.mxu0 %v4301_v29 }
 0x14d   : > { %1923 = vmatmul.mubr.bf16.gmra.mrb[88].mxu1 %v4303_v30  ;;  %1614 = vmatmul.mubr.bf16.gmra.mrb[88].mxu0 %v4303_v30 }
 0x14e   : > { %1930 = vmatprep.mubr.bf16.mxu1 %v4304_v31  ;;  %1623 = vmatprep.mubr.bf16.mxu0 %v4304_v31 }
 0x155   : > { %1931 = vmatmul.mubr.bf16.gmra.mrb[92].mxu1 %v4306_v32  ;;  %1624 = vmatmul.mubr.bf16.gmra.mrb[92].mxu0 %v4306_v32 }
 0x156   : > { %1938 = vmatprep.mubr.bf16.mxu1 %v4307_v33  ;;  %1633 = vmatprep.mubr.bf16.mxu0 %v4307_v33  ;;  %v4324_v33 = vld [vmem:[#allocation3 + $0x1d0] ss:$8 sps:$4 sm:$0xff]  }
 0x15d   : > { %1939 = vmatmul.mubr.bf16.gmra.mrb[96].mxu1 %v4309_v34  ;;  %1634 = vmatmul.mubr.bf16.gmra.mrb[96].mxu0 %v4309_v34 }
 0x15e   : > { %1946 = vmatprep.mubr.bf16.mxu1 %v4310_v35  ;;  %1643 = vmatprep.mubr.bf16.mxu0 %v4310_v35 }
 0x165   : > { %1947 = vmatmul.mubr.bf16.gmra.mrb[100].mxu1 %v4312_v37  ;;  %1644 = vmatmul.mubr.bf16.gmra.mrb[100].mxu0 %v4312_v37  ;;  %v4325_v37 = vld [vmem:[#allocation3 + $0x1e4] ss:$8 sps:$4 sm:$0xff]  }
 0x166   : > { %1954 = vmatprep.mubr.bf16.mxu1 %v4313_v39  ;;  %1653 = vmatprep.mubr.bf16.mxu0 %v4313_v39 }
 0x16d   : > { %1955 = vmatmul.mubr.bf16.gmra.mrb[104].mxu1 %v4315_v45  ;;  %1654 = vmatmul.mubr.bf16.gmra.mrb[104].mxu0 %v4315_v45 }
 0x16e   : > { %1962 = vmatprep.mubr.bf16.mxu1 %v4316_v48  ;;  %1663 = vmatprep.mubr.bf16.mxu0 %v4316_v48 }
 0x170   : > { %v1748_v53 = vpop.f32.mrb[0].mxu1  ;;  %v1395_v55 = vpop.f32.mrb[0].mxu0 }
 0x171   : > { %v2614_v54 = vadd.f32 %v4752_v50, %v1748_v53  ;;  %v1750_v56 = vpop.f32.mrb[1].mxu1  ;;  %v2612_v58 = vadd.f32 %v4755_v51, %v1395_v55  ;;  %v1397_v59 = vpop.f32.mrb[1].mxu0 }
 0x172   : > { %v1751_v60 = vpop.f32.mrb[2].mxu1  ;;  %v2613_v63 = vadd.f32 %v4757_v52, %v1397_v59  ;;  %v1399_v1 = vpop.f32.mrb[2].mxu0  ;;  %v4327_v56 = vld [vmem:[#allocation3 + $0x1e0] ss:$8 sps:$4 sm:$0xff]  }
 0x173   : > { %v3958_v62 = vpack.c.bf16 %v2614_v54, %v2614_v54  ;;  %v2617_v0 = vadd.f32 %v4752_v50, %v1751_v60  ;;  %v1753_v2 = vpop.f32.mrb[3].mxu1  ;;  %v2615_v3 = vadd.f32 %v4755_v51, %v1399_v1  ;;  %v1401_v4 = vpop.f32.mrb[3].mxu0  ;;  %v4328_v60 = vld [vmem:[#allocation3 + $0x1f4] ss:$8 sps:$4 sm:$0xff]  }
 0x174   : > { %v3957_v5 = vpack.c.bf16 %v2613_v63, %v2612_v58  ;;  %v2616_v7 = vadd.f32 %v4757_v52, %v1401_v4 }
 0x175   : > { %3445 = vst [vmem:[%s4764_s29 + $0x8] sm:$0xf] %v3958_v62  ;;  %v3960_v6 = vpack.c.bf16 %v2617_v0, %v2617_v0  ;;  %1963 = vmatmul.mubr.bf16.gmra.mrb[108].mxu1 %v4318_v57  ;;  %1664 = vmatmul.mubr.bf16.gmra.mrb[108].mxu0 %v4318_v57 }
 0x176   : > { %1970 = vmatprep.mubr.bf16.mxu1 %v4319_v61  ;;  %3444 = vst [vmem:[%s4764_s29] sm:$0xff] %v3957_v5  ;;  %v3959_v8 = vpack.c.bf16 %v2616_v7, %v2615_v3  ;;  %1673 = vmatprep.mubr.bf16.mxu0 %v4319_v61 }
 0x177   : > { %3447 = vst [vmem:[%s4764_s29 + $0x14] sm:$0xf] %v3960_v6 }
 0x178   : > { %v1756_v9 = vpop.f32.mrb[4].mxu1  ;;  %3446 = vst [vmem:[%s4764_s29 + $0xc] sm:$0xff] %v3959_v8  ;;  %v1405_v11 = vpop.f32.mrb[4].mxu0 }
 0x179   : > { %v2620_v10 = vadd.f32 %v4752_v50, %v1756_v9  ;;  %v1758_v12 = vpop.f32.mrb[5].mxu1  ;;  %v2618_v14 = vadd.f32 %v4755_v51, %v1405_v11  ;;  %v1407_v15 = vpop.f32.mrb[5].mxu0 }
 0x17a   : > { %v1759_v16 = vpop.f32.mrb[6].mxu1  ;;  %v2619_v19 = vadd.f32 %v4757_v52, %v1407_v15  ;;  %v1409_v21 = vpop.f32.mrb[6].mxu0  ;;  %v4330_v12 = vld [vmem:[#allocation3 + $0x1f0] ss:$8 sps:$4 sm:$0xff]  }
 0x17b   : > { %v3962_v18 = vpack.c.bf16 %v2620_v10, %v2620_v10  ;;  %v2623_v20 = vadd.f32 %v4752_v50, %v1759_v16  ;;  %v1761_v22 = vpop.f32.mrb[7].mxu1  ;;  %v2621_v23 = vadd.f32 %v4755_v51, %v1409_v21  ;;  %v1411_v24 = vpop.f32.mrb[7].mxu0 }
 0x17c   : > { %v3961_v25 = vpack.c.bf16 %v2619_v19, %v2618_v14  ;;  %v2622_v27 = vadd.f32 %v4757_v52, %v1411_v24 }
 0x17d   : > { %3449 = vst [vmem:[%s4764_s29 + $0x20] sm:$0xf] %v3962_v18  ;;  %v3964_v26 = vpack.c.bf16 %v2623_v20, %v2623_v20  ;;  %1971 = vmatmul.mubr.bf16.gmra.mrb[112].mxu1 %v4321_v13  ;;  %1674 = vmatmul.mubr.bf16.gmra.mrb[112].mxu0 %v4321_v13 }
 0x17e   : > { %1978 = vmatprep.mubr.bf16.mxu1 %v4322_v17  ;;  %3448 = vst [vmem:[%s4764_s29 + $0x18] sm:$0xff] %v3961_v25  ;;  %v3963_v28 = vpack.c.bf16 %v2622_v27, %v2621_v23  ;;  %1683 = vmatprep.mubr.bf16.mxu0 %v4322_v17 }
 0x17f   : > { %3451 = vst [vmem:[%s4764_s29 + $0x2c] sm:$0xf] %v3964_v26 }
 0x180   : > { %v1764_v29 = vpop.f32.mrb[8].mxu1  ;;  %3450 = vst [vmem:[%s4764_s29 + $0x24] sm:$0xff] %v3963_v28  ;;  %v1415_v31 = vpop.f32.mrb[8].mxu0 }
 0x181   : > { %v2626_v30 = vadd.f32 %v4752_v50, %v1764_v29  ;;  %v1766_v32 = vpop.f32.mrb[9].mxu1  ;;  %v2624_v34 = vadd.f32 %v4755_v51, %v1415_v31  ;;  %v1417_v35 = vpop.f32.mrb[9].mxu0 }
 0x182   : > { %v1767_v36 = vpop.f32.mrb[10].mxu1  ;;  %v2625_v39 = vadd.f32 %v4757_v52, %v1417_v35  ;;  %v1419_v41 = vpop.f32.mrb[10].mxu0 }
 0x183   : > { %v3966_v38 = vpack.c.bf16 %v2626_v30, %v2626_v30  ;;  %v2629_v40 = vadd.f32 %v4752_v50, %v1767_v36  ;;  %v1769_v42 = vpop.f32.mrb[11].mxu1  ;;  %v2627_v43 = vadd.f32 %v4755_v51, %v1419_v41  ;;  %v1421_v44 = vpop.f32.mrb[11].mxu0 }
 0x184   : > { %v3965_v45 = vpack.c.bf16 %v2625_v39, %v2624_v34  ;;  %v2628_v47 = vadd.f32 %v4757_v52, %v1421_v44 }
 0x185   : > { %3453 = vst [vmem:[%s4764_s29 + $0x38] sm:$0xf] %v3966_v38  ;;  %v3968_v46 = vpack.c.bf16 %v2629_v40, %v2629_v40  ;;  %1979 = vmatmul.mubr.bf16.gmra.mrb[116].mxu1 %v4324_v33  ;;  %1684 = vmatmul.mubr.bf16.gmra.mrb[116].mxu0 %v4324_v33 }
 0x186   : > { %1986 = vmatprep.mubr.bf16.mxu1 %v4325_v37  ;;  %3452 = vst [vmem:[%s4764_s29 + $0x30] sm:$0xff] %v3965_v45  ;;  %v3967_v48 = vpack.c.bf16 %v2628_v47, %v2627_v43  ;;  %1693 = vmatprep.mubr.bf16.mxu0 %v4325_v37 }
 0x187   : > { %3455 = vst [vmem:[%s4764_s29 + $0x44] sm:$0xf] %v3968_v46 }
 0x188   : > { %v1772_v49 = vpop.f32.mrb[12].mxu1  ;;  %3454 = vst [vmem:[%s4764_s29 + $0x3c] sm:$0xff] %v3967_v48  ;;  %v1425_v54 = vpop.f32.mrb[12].mxu0 }
 0x189   : > { %v2632_v53 = vadd.f32 %v4752_v50, %v1772_v49  ;;  %v1774_v55 = vpop.f32.mrb[13].mxu1  ;;  %v2630_v57 = vadd.f32 %v4755_v51, %v1425_v54  ;;  %v1427_v58 = vpop.f32.mrb[13].mxu0 }
 0x18a   : > { %v1775_v59 = vpop.f32.mrb[14].mxu1  ;;  %v2631_v62 = vadd.f32 %v4757_v52, %v1427_v58  ;;  %v1429_v0 = vpop.f32.mrb[14].mxu0 }
 0x18b   : > { %v3970_v61 = vpack.c.bf16 %v2632_v53, %v2632_v53  ;;  %v2635_v63 = vadd.f32 %v4752_v50, %v1775_v59  ;;  %v1777_v1 = vpop.f32.mrb[15].mxu1  ;;  %v2633_v2 = vadd.f32 %v4755_v51, %v1429_v0  ;;  %v1431_v3 = vpop.f32.mrb[15].mxu0 }
 0x18c   : > { %v3969_v4 = vpack.c.bf16 %v2631_v62, %v2630_v57  ;;  %v2634_v6 = vadd.f32 %v4757_v52, %v1431_v3 }
 0x18d   : > { %3457 = vst [vmem:[%s4764_s29 + $0x50] sm:$0xf] %v3970_v61  ;;  %v3972_v5 = vpack.c.bf16 %v2635_v63, %v2635_v63  ;;  %1987 = vmatmul.mubr.bf16.gmra.mrb[120].mxu1 %v4327_v56  ;;  %1694 = vmatmul.mubr.bf16.gmra.mrb[120].mxu0 %v4327_v56 }
 0x18e   : > { %1994 = vmatprep.mubr.bf16.mxu1 %v4328_v60  ;;  %3456 = vst [vmem:[%s4764_s29 + $0x48] sm:$0xff] %v3969_v4  ;;  %v3971_v7 = vpack.c.bf16 %v2634_v6, %v2633_v2  ;;  %1703 = vmatprep.mubr.bf16.mxu0 %v4328_v60 }
 0x18f   : > { %3459 = vst [vmem:[%s4764_s29 + $0x5c] sm:$0xf] %v3972_v5 }
 0x190   : > { %v1780_v8 = vpop.f32.mrb[16].mxu1  ;;  %3458 = vst [vmem:[%s4764_s29 + $0x54] sm:$0xff] %v3971_v7  ;;  %v1435_v10 = vpop.f32.mrb[16].mxu0 }
 0x191   : > { %v2638_v9 = vadd.f32 %v4752_v50, %v1780_v8  ;;  %v1782_v11 = vpop.f32.mrb[17].mxu1  ;;  %v2636_v13 = vadd.f32 %v4755_v51, %v1435_v10  ;;  %v1437_v14 = vpop.f32.mrb[17].mxu0 }
 0x192   : > { %v1783_v15 = vpop.f32.mrb[18].mxu1  ;;  %v2637_v17 = vadd.f32 %v4757_v52, %v1437_v14  ;;  %v1439_v19 = vpop.f32.mrb[18].mxu0 }
 0x193   : > { %v3974_v16 = vpack.c.bf16 %v2638_v9, %v2638_v9  ;;  %v2641_v18 = vadd.f32 %v4752_v50, %v1783_v15  ;;  %v1785_v20 = vpop.f32.mrb[19].mxu1  ;;  %v2639_v21 = vadd.f32 %v4755_v51, %v1439_v19  ;;  %v1441_v22 = vpop.f32.mrb[19].mxu0 }
 0x194   : > { %v3973_v23 = vpack.c.bf16 %v2637_v17, %v2636_v13  ;;  %v2640_v25 = vadd.f32 %v4757_v52, %v1441_v22 }
 0x195   : > { %3461 = vst [vmem:[%s4764_s29 + $0x68] sm:$0xf] %v3974_v16  ;;  %v3976_v24 = vpack.c.bf16 %v2641_v18, %v2641_v18  ;;  %1995 = vmatmul.mubr.bf16.gmra.mrb[124].mxu1 %v4330_v12  ;;  %1704 = vmatmul.mubr.bf16.gmra.mrb[124].mxu0 %v4330_v12 }
 0x196   : > { %3460 = vst [vmem:[%s4764_s29 + $0x60] sm:$0xff] %v3973_v23  ;;  %v3975_v26 = vpack.c.bf16 %v2640_v25, %v2639_v21 }
 0x197   : > { %3463 = vst [vmem:[%s4764_s29 + $0x74] sm:$0xf] %v3976_v24 }
 0x198   : > { %v1788_v27 = vpop.f32.mrb[20].mxu1  ;;  %3462 = vst [vmem:[%s4764_s29 + $0x6c] sm:$0xff] %v3975_v26  ;;  %v1445_v29 = vpop.f32.mrb[20].mxu0 }
 0x199   : > { %v2644_v28 = vadd.f32 %v4752_v50, %v1788_v27  ;;  %v1790_v30 = vpop.f32.mrb[21].mxu1  ;;  %v2642_v31 = vadd.f32 %v4755_v51, %v1445_v29  ;;  %v1447_v32 = vpop.f32.mrb[21].mxu0 }
 0x19a   : > { %v1791_v33 = vpop.f32.mrb[22].mxu1  ;;  %v2643_v35 = vadd.f32 %v4757_v52, %v1447_v32  ;;  %v1449_v37 = vpop.f32.mrb[22].mxu0 }
 0x19b   : > { %v3978_v34 = vpack.c.bf16 %v2644_v28, %v2644_v28  ;;  %v2647_v36 = vadd.f32 %v4752_v50, %v1791_v33  ;;  %v1793_v38 = vpop.f32.mrb[23].mxu1  ;;  %v2645_v39 = vadd.f32 %v4755_v51, %v1449_v37  ;;  %v1451_v40 = vpop.f32.mrb[23].mxu0 }
 0x19c   : > { %v3977_v41 = vpack.c.bf16 %v2643_v35, %v2642_v31  ;;  %v2646_v43 = vadd.f32 %v4757_v52, %v1451_v40 }
 0x19d   : > { %3465 = vst [vmem:[%s4764_s29 + $0x80] sm:$0xf] %v3978_v34  ;;  %v3980_v42 = vpack.c.bf16 %v2647_v36, %v2647_v36 }
 0x19e   : > { %3464 = vst [vmem:[%s4764_s29 + $0x78] sm:$0xff] %v3977_v41  ;;  %v3979_v44 = vpack.c.bf16 %v2646_v43, %v2645_v39 }
 0x19f   : > { %3467 = vst [vmem:[%s4764_s29 + $0x8c] sm:$0xf] %v3980_v42 }
 0x1a0   : > { %v1796_v45 = vpop.f32.mrb[24].mxu1  ;;  %3466 = vst [vmem:[%s4764_s29 + $0x84] sm:$0xff] %v3979_v44  ;;  %v1455_v47 = vpop.f32.mrb[24].mxu0 }
 0x1a1   : > { %v2650_v46 = vadd.f32 %v4752_v50, %v1796_v45  ;;  %v1798_v48 = vpop.f32.mrb[25].mxu1  ;;  %v2648_v49 = vadd.f32 %v4755_v51, %v1455_v47  ;;  %v1457_v53 = vpop.f32.mrb[25].mxu0 }
 0x1a2   : > { %v1799_v54 = vpop.f32.mrb[26].mxu1  ;;  %v2649_v56 = vadd.f32 %v4757_v52, %v1457_v53  ;;  %v1459_v58 = vpop.f32.mrb[26].mxu0 }
 0x1a3   : > { %v3982_v55 = vpack.c.bf16 %v2650_v46, %v2650_v46  ;;  %v2653_v57 = vadd.f32 %v4752_v50, %v1799_v54  ;;  %v1801_v59 = vpop.f32.mrb[27].mxu1  ;;  %v2651_v60 = vadd.f32 %v4755_v51, %v1459_v58  ;;  %v1461_v61 = vpop.f32.mrb[27].mxu0 }
 0x1a4   : > { %v3981_v62 = vpack.c.bf16 %v2649_v56, %v2648_v49  ;;  %v2652_v0 = vadd.f32 %v4757_v52, %v1461_v61 }
 0x1a5   : > { %3469 = vst [vmem:[%s4764_s29 + $0x98] sm:$0xf] %v3982_v55  ;;  %v3984_v63 = vpack.c.bf16 %v2653_v57, %v2653_v57 }
 0x1a6   : > { %3468 = vst [vmem:[%s4764_s29 + $0x90] sm:$0xff] %v3981_v62  ;;  %v3983_v1 = vpack.c.bf16 %v2652_v0, %v2651_v60 }
 0x1a7   : > { %3471 = vst [vmem:[%s4764_s29 + $0xa4] sm:$0xf] %v3984_v63 }
 0x1a8   : > { %v1804_v2 = vpop.f32.mrb[28].mxu1  ;;  %3470 = vst [vmem:[%s4764_s29 + $0x9c] sm:$0xff] %v3983_v1  ;;  %v1465_v4 = vpop.f32.mrb[28].mxu0 }
 0x1a9   : > { %v2656_v3 = vadd.f32 %v4752_v50, %v1804_v2  ;;  %v1806_v5 = vpop.f32.mrb[29].mxu1  ;;  %v2654_v6 = vadd.f32 %v4755_v51, %v1465_v4  ;;  %v1467_v7 = vpop.f32.mrb[29].mxu0 }
 0x1aa   : > { %v1807_v8 = vpop.f32.mrb[30].mxu1  ;;  %v2655_v10 = vadd.f32 %v4757_v52, %v1467_v7  ;;  %v1469_v12 = vpop.f32.mrb[30].mxu0 }
 0x1ab   : > { %v3986_v9 = vpack.c.bf16 %v2656_v3, %v2656_v3  ;;  %v2659_v11 = vadd.f32 %v4752_v50, %v1807_v8  ;;  %v1809_v13 = vpop.f32.mrb[31].mxu1  ;;  %v2657_v14 = vadd.f32 %v4755_v51, %v1469_v12  ;;  %v1471_v15 = vpop.f32.mrb[31].mxu0 }
 0x1ac   : > { %v3985_v16 = vpack.c.bf16 %v2655_v10, %v2654_v6  ;;  %v2658_v18 = vadd.f32 %v4757_v52, %v1471_v15 }
 0x1ad   : > { %3473 = vst [vmem:[%s4764_s29 + $0xb0] sm:$0xf] %v3986_v9  ;;  %v3988_v17 = vpack.c.bf16 %v2659_v11, %v2659_v11 }
 0x1ae   : > { %3472 = vst [vmem:[%s4764_s29 + $0xa8] sm:$0xff] %v3985_v16  ;;  %v3987_v19 = vpack.c.bf16 %v2658_v18, %v2657_v14 }
 0x1af   : > { %3475 = vst [vmem:[%s4764_s29 + $0xbc] sm:$0xf] %v3988_v17 }
 0x1b0   : > { %v1812_v20 = vpop.f32.mrb[32].mxu1  ;;  %3474 = vst [vmem:[%s4764_s29 + $0xb4] sm:$0xff] %v3987_v19  ;;  %v1475_v22 = vpop.f32.mrb[32].mxu0 }
 0x1b1   : > { %v2662_v21 = vadd.f32 %v4752_v50, %v1812_v20  ;;  %v1814_v23 = vpop.f32.mrb[33].mxu1  ;;  %v2660_v24 = vadd.f32 %v4755_v51, %v1475_v22  ;;  %v1477_v25 = vpop.f32.mrb[33].mxu0 }
 0x1b2   : > { %v1815_v26 = vpop.f32.mrb[34].mxu1  ;;  %v2661_v28 = vadd.f32 %v4757_v52, %v1477_v25  ;;  %v1479_v30 = vpop.f32.mrb[34].mxu0 }
 0x1b3   : > { %v3990_v27 = vpack.c.bf16 %v2662_v21, %v2662_v21  ;;  %v2665_v29 = vadd.f32 %v4752_v50, %v1815_v26  ;;  %v1817_v31 = vpop.f32.mrb[35].mxu1  ;;  %v2663_v32 = vadd.f32 %v4755_v51, %v1479_v30  ;;  %v1481_v33 = vpop.f32.mrb[35].mxu0 }
 0x1b4   : > { %v3989_v34 = vpack.c.bf16 %v2661_v28, %v2660_v24  ;;  %v2664_v36 = vadd.f32 %v4757_v52, %v1481_v33 }
 0x1b5   : > { %3477 = vst [vmem:[%s4764_s29 + $0xc8] sm:$0xf] %v3990_v27  ;;  %v3992_v35 = vpack.c.bf16 %v2665_v29, %v2665_v29 }
 0x1b6   : > { %3476 = vst [vmem:[%s4764_s29 + $0xc0] sm:$0xff] %v3989_v34  ;;  %v3991_v37 = vpack.c.bf16 %v2664_v36, %v2663_v32 }
 0x1b7   : > { %3479 = vst [vmem:[%s4764_s29 + $0xd4] sm:$0xf] %v3992_v35 }
 0x1b8   : > { %v1820_v38 = vpop.f32.mrb[36].mxu1  ;;  %3478 = vst [vmem:[%s4764_s29 + $0xcc] sm:$0xff] %v3991_v37  ;;  %v1485_v40 = vpop.f32.mrb[36].mxu0 }
 0x1b9   : > { %v2668_v39 = vadd.f32 %v4752_v50, %v1820_v38  ;;  %v1822_v41 = vpop.f32.mrb[37].mxu1  ;;  %v2666_v42 = vadd.f32 %v4755_v51, %v1485_v40  ;;  %v1487_v43 = vpop.f32.mrb[37].mxu0 }
 0x1ba   : > { %v1823_v44 = vpop.f32.mrb[38].mxu1  ;;  %v2667_v46 = vadd.f32 %v4757_v52, %v1487_v43  ;;  %v1489_v48 = vpop.f32.mrb[38].mxu0 }
 0x1bb   : > { %v3994_v45 = vpack.c.bf16 %v2668_v39, %v2668_v39  ;;  %v2671_v47 = vadd.f32 %v4752_v50, %v1823_v44  ;;  %v1825_v49 = vpop.f32.mrb[39].mxu1  ;;  %v2669_v53 = vadd.f32 %v4755_v51, %v1489_v48  ;;  %v1491_v54 = vpop.f32.mrb[39].mxu0 }
 0x1bc   : > { %v3993_v55 = vpack.c.bf16 %v2667_v46, %v2666_v42  ;;  %v2670_v57 = vadd.f32 %v4757_v52, %v1491_v54 }
 0x1bd   : > { %3481 = vst [vmem:[%s4764_s29 + $0xe0] sm:$0xf] %v3994_v45  ;;  %v3996_v56 = vpack.c.bf16 %v2671_v47, %v2671_v47 }
 0x1be   : > { %3480 = vst [vmem:[%s4764_s29 + $0xd8] sm:$0xff] %v3993_v55  ;;  %v3995_v58 = vpack.c.bf16 %v2670_v57, %v2669_v53 }
 0x1bf   : > { %3483 = vst [vmem:[%s4764_s29 + $0xec] sm:$0xf] %v3996_v56 }
 0x1c0   : > { %v1828_v59 = vpop.f32.mrb[40].mxu1  ;;  %3482 = vst [vmem:[%s4764_s29 + $0xe4] sm:$0xff] %v3995_v58  ;;  %v1495_v61 = vpop.f32.mrb[40].mxu0 }
 0x1c1   : > { %v2674_v60 = vadd.f32 %v4752_v50, %v1828_v59  ;;  %v1830_v62 = vpop.f32.mrb[41].mxu1  ;;  %v2672_v63 = vadd.f32 %v4755_v51, %v1495_v61  ;;  %v1497_v0 = vpop.f32.mrb[41].mxu0 }
 0x1c2   : > { %v1831_v1 = vpop.f32.mrb[42].mxu1  ;;  %v2673_v3 = vadd.f32 %v4757_v52, %v1497_v0  ;;  %v1499_v5 = vpop.f32.mrb[42].mxu0 }
 0x1c3   : > { %v3998_v2 = vpack.c.bf16 %v2674_v60, %v2674_v60  ;;  %v2677_v4 = vadd.f32 %v4752_v50, %v1831_v1  ;;  %v1833_v6 = vpop.f32.mrb[43].mxu1  ;;  %v2675_v7 = vadd.f32 %v4755_v51, %v1499_v5  ;;  %v1501_v8 = vpop.f32.mrb[43].mxu0 }
 0x1c4   : > { %v3997_v9 = vpack.c.bf16 %v2673_v3, %v2672_v63  ;;  %v2676_v11 = vadd.f32 %v4757_v52, %v1501_v8 }
 0x1c5   : > { %3485 = vst [vmem:[%s4764_s29 + $0xf8] sm:$0xf] %v3998_v2  ;;  %v4000_v10 = vpack.c.bf16 %v2677_v4, %v2677_v4 }
 0x1c6   : > { %3484 = vst [vmem:[%s4764_s29 + $0xf0] sm:$0xff] %v3997_v9  ;;  %v3999_v12 = vpack.c.bf16 %v2676_v11, %v2675_v7 }
 0x1c7   : > { %3487 = vst [vmem:[%s4764_s29 + $0x104] sm:$0xf] %v4000_v10 }
 0x1c8   : > { %v1836_v13 = vpop.f32.mrb[44].mxu1  ;;  %3486 = vst [vmem:[%s4764_s29 + $0xfc] sm:$0xff] %v3999_v12  ;;  %v1505_v15 = vpop.f32.mrb[44].mxu0 }
 0x1c9   : > { %v2680_v14 = vadd.f32 %v4752_v50, %v1836_v13  ;;  %v1838_v16 = vpop.f32.mrb[45].mxu1  ;;  %v2678_v17 = vadd.f32 %v4755_v51, %v1505_v15  ;;  %v1507_v18 = vpop.f32.mrb[45].mxu0 }
 0x1ca   : > { %v1839_v19 = vpop.f32.mrb[46].mxu1  ;;  %v2679_v21 = vadd.f32 %v4757_v52, %v1507_v18  ;;  %v1509_v23 = vpop.f32.mrb[46].mxu0 }
 0x1cb   : > { %v4002_v20 = vpack.c.bf16 %v2680_v14, %v2680_v14  ;;  %v2683_v22 = vadd.f32 %v4752_v50, %v1839_v19  ;;  %v1841_v24 = vpop.f32.mrb[47].mxu1  ;;  %v2681_v25 = vadd.f32 %v4755_v51, %v1509_v23  ;;  %v1511_v26 = vpop.f32.mrb[47].mxu0 }
 0x1cc   : > { %v4001_v27 = vpack.c.bf16 %v2679_v21, %v2678_v17  ;;  %v2682_v29 = vadd.f32 %v4757_v52, %v1511_v26 }
 0x1cd   : > { %3489 = vst [vmem:[%s4764_s29 + $0x110] sm:$0xf] %v4002_v20  ;;  %v4004_v28 = vpack.c.bf16 %v2683_v22, %v2683_v22 }
 0x1ce   : > { %3488 = vst [vmem:[%s4764_s29 + $0x108] sm:$0xff] %v4001_v27  ;;  %v4003_v30 = vpack.c.bf16 %v2682_v29, %v2681_v25 }
 0x1cf   : > { %3491 = vst [vmem:[%s4764_s29 + $0x11c] sm:$0xf] %v4004_v28 }
 0x1d0   : > { %v1844_v31 = vpop.f32.mrb[48].mxu1  ;;  %3490 = vst [vmem:[%s4764_s29 + $0x114] sm:$0xff] %v4003_v30  ;;  %v1515_v33 = vpop.f32.mrb[48].mxu0 }
 0x1d1   : > { %v2686_v32 = vadd.f32 %v4752_v50, %v1844_v31  ;;  %v1846_v34 = vpop.f32.mrb[49].mxu1  ;;  %v2684_v35 = vadd.f32 %v4755_v51, %v1515_v33  ;;  %v1517_v36 = vpop.f32.mrb[49].mxu0 }
 0x1d2   : > { %v1847_v37 = vpop.f32.mrb[50].mxu1  ;;  %v2685_v39 = vadd.f32 %v4757_v52, %v1517_v36  ;;  %v1519_v41 = vpop.f32.mrb[50].mxu0 }
 0x1d3   : > { %v4006_v38 = vpack.c.bf16 %v2686_v32, %v2686_v32  ;;  %v2689_v40 = vadd.f32 %v4752_v50, %v1847_v37  ;;  %v1849_v42 = vpop.f32.mrb[51].mxu1  ;;  %v2687_v43 = vadd.f32 %v4755_v51, %v1519_v41  ;;  %v1521_v44 = vpop.f32.mrb[51].mxu0 }
 0x1d4   : > { %v4005_v45 = vpack.c.bf16 %v2685_v39, %v2684_v35  ;;  %v2688_v47 = vadd.f32 %v4757_v52, %v1521_v44 }
 0x1d5   : > { %3493 = vst [vmem:[%s4764_s29 + $0x128] sm:$0xf] %v4006_v38  ;;  %v4008_v46 = vpack.c.bf16 %v2689_v40, %v2689_v40 }
 0x1d6   : > { %3492 = vst [vmem:[%s4764_s29 + $0x120] sm:$0xff] %v4005_v45  ;;  %v4007_v48 = vpack.c.bf16 %v2688_v47, %v2687_v43 }
 0x1d7   : > { %3495 = vst [vmem:[%s4764_s29 + $0x134] sm:$0xf] %v4008_v46 }
 0x1d8   : > { %v1852_v49 = vpop.f32.mrb[52].mxu1  ;;  %3494 = vst [vmem:[%s4764_s29 + $0x12c] sm:$0xff] %v4007_v48  ;;  %v1525_v54 = vpop.f32.mrb[52].mxu0 }
 0x1d9   : > { %v2692_v53 = vadd.f32 %v4752_v50, %v1852_v49  ;;  %v1854_v55 = vpop.f32.mrb[53].mxu1  ;;  %v2690_v56 = vadd.f32 %v4755_v51, %v1525_v54  ;;  %v1527_v57 = vpop.f32.mrb[53].mxu0 }
 0x1da   : > { %v1855_v58 = vpop.f32.mrb[54].mxu1  ;;  %v2691_v60 = vadd.f32 %v4757_v52, %v1527_v57  ;;  %v1529_v62 = vpop.f32.mrb[54].mxu0 }
 0x1db   : > { %v4010_v59 = vpack.c.bf16 %v2692_v53, %v2692_v53  ;;  %v2695_v61 = vadd.f32 %v4752_v50, %v1855_v58  ;;  %v1857_v63 = vpop.f32.mrb[55].mxu1  ;;  %v2693_v0 = vadd.f32 %v4755_v51, %v1529_v62  ;;  %v1531_v1 = vpop.f32.mrb[55].mxu0 }
 0x1dc   : > { %v4009_v2 = vpack.c.bf16 %v2691_v60, %v2690_v56  ;;  %v2694_v4 = vadd.f32 %v4757_v52, %v1531_v1 }
 0x1dd   : > { %3497 = vst [vmem:[%s4764_s29 + $0x140] sm:$0xf] %v4010_v59  ;;  %v4012_v3 = vpack.c.bf16 %v2695_v61, %v2695_v61 }
 0x1de   : > { %3496 = vst [vmem:[%s4764_s29 + $0x138] sm:$0xff] %v4009_v2  ;;  %v4011_v5 = vpack.c.bf16 %v2694_v4, %v2693_v0 }
 0x1df   : > { %3499 = vst [vmem:[%s4764_s29 + $0x14c] sm:$0xf] %v4012_v3 }
 0x1e0   : > { %v1860_v6 = vpop.f32.mrb[56].mxu1  ;;  %3498 = vst [vmem:[%s4764_s29 + $0x144] sm:$0xff] %v4011_v5  ;;  %v1535_v8 = vpop.f32.mrb[56].mxu0 }
 0x1e1   : > { %v2698_v7 = vadd.f32 %v4752_v50, %v1860_v6  ;;  %v1862_v9 = vpop.f32.mrb[57].mxu1  ;;  %v2696_v10 = vadd.f32 %v4755_v51, %v1535_v8  ;;  %v1537_v11 = vpop.f32.mrb[57].mxu0 }
 0x1e2   : > { %v1863_v12 = vpop.f32.mrb[58].mxu1  ;;  %v2697_v14 = vadd.f32 %v4757_v52, %v1537_v11  ;;  %v1539_v16 = vpop.f32.mrb[58].mxu0 }
 0x1e3   : > { %v4014_v13 = vpack.c.bf16 %v2698_v7, %v2698_v7  ;;  %v2701_v15 = vadd.f32 %v4752_v50, %v1863_v12  ;;  %v1865_v17 = vpop.f32.mrb[59].mxu1  ;;  %v2699_v18 = vadd.f32 %v4755_v51, %v1539_v16  ;;  %v1541_v19 = vpop.f32.mrb[59].mxu0 }
 0x1e4   : > { %v4013_v20 = vpack.c.bf16 %v2697_v14, %v2696_v10  ;;  %v2700_v22 = vadd.f32 %v4757_v52, %v1541_v19 }
 0x1e5   : > { %3501 = vst [vmem:[%s4764_s29 + $0x158] sm:$0xf] %v4014_v13  ;;  %v4016_v21 = vpack.c.bf16 %v2701_v15, %v2701_v15 }
 0x1e6   : > { %3500 = vst [vmem:[%s4764_s29 + $0x150] sm:$0xff] %v4013_v20  ;;  %v4015_v23 = vpack.c.bf16 %v2700_v22, %v2699_v18 }
 0x1e7   : > { %3503 = vst [vmem:[%s4764_s29 + $0x164] sm:$0xf] %v4016_v21 }
 0x1e8   : > { %v1868_v24 = vpop.f32.mrb[60].mxu1  ;;  %3502 = vst [vmem:[%s4764_s29 + $0x15c] sm:$0xff] %v4015_v23  ;;  %v1545_v26 = vpop.f32.mrb[60].mxu0 }
 0x1e9   : > { %v2704_v25 = vadd.f32 %v4752_v50, %v1868_v24  ;;  %v1870_v27 = vpop.f32.mrb[61].mxu1  ;;  %v2702_v28 = vadd.f32 %v4755_v51, %v1545_v26  ;;  %v1547_v29 = vpop.f32.mrb[61].mxu0 }
 0x1ea   : > { %v1871_v30 = vpop.f32.mrb[62].mxu1  ;;  %v2703_v32 = vadd.f32 %v4757_v52, %v1547_v29  ;;  %v1549_v34 = vpop.f32.mrb[62].mxu0 }
 0x1eb   : > { %v4018_v31 = vpack.c.bf16 %v2704_v25, %v2704_v25  ;;  %v2707_v33 = vadd.f32 %v4752_v50, %v1871_v30  ;;  %v1873_v35 = vpop.f32.mrb[63].mxu1  ;;  %v2705_v36 = vadd.f32 %v4755_v51, %v1549_v34  ;;  %v1551_v37 = vpop.f32.mrb[63].mxu0 }
 0x1ec   : > { %v4017_v38 = vpack.c.bf16 %v2703_v32, %v2702_v28  ;;  %v2706_v40 = vadd.f32 %v4757_v52, %v1551_v37 }
 0x1ed   : > { %3505 = vst [vmem:[%s4764_s29 + $0x170] sm:$0xf] %v4018_v31  ;;  %v4020_v39 = vpack.c.bf16 %v2707_v33, %v2707_v33 }
 0x1ee   : > { %3504 = vst [vmem:[%s4764_s29 + $0x168] sm:$0xff] %v4017_v38  ;;  %v4019_v41 = vpack.c.bf16 %v2706_v40, %v2705_v36 }
 0x1ef   : > { %3507 = vst [vmem:[%s4764_s29 + $0x17c] sm:$0xf] %v4020_v39 }
 0x1f0   : > { %v1876_v42 = vpop.f32.mrb[64].mxu1  ;;  %3506 = vst [vmem:[%s4764_s29 + $0x174] sm:$0xff] %v4019_v41  ;;  %v1555_v44 = vpop.f32.mrb[64].mxu0 }
 0x1f1   : > { %v2710_v43 = vadd.f32 %v4752_v50, %v1876_v42  ;;  %v1878_v45 = vpop.f32.mrb[65].mxu1  ;;  %v2708_v46 = vadd.f32 %v4755_v51, %v1555_v44  ;;  %v1557_v47 = vpop.f32.mrb[65].mxu0 }
 0x1f2   : > { %v1879_v48 = vpop.f32.mrb[66].mxu1  ;;  %v2709_v53 = vadd.f32 %v4757_v52, %v1557_v47  ;;  %v1559_v55 = vpop.f32.mrb[66].mxu0 }
 0x1f3   : > { %v4022_v49 = vpack.c.bf16 %v2710_v43, %v2710_v43  ;;  %v2713_v54 = vadd.f32 %v4752_v50, %v1879_v48  ;;  %v1881_v56 = vpop.f32.mrb[67].mxu1  ;;  %v2711_v57 = vadd.f32 %v4755_v51, %v1559_v55  ;;  %v1561_v58 = vpop.f32.mrb[67].mxu0 }
 0x1f4   : > { %v4021_v59 = vpack.c.bf16 %v2709_v53, %v2708_v46  ;;  %v2712_v61 = vadd.f32 %v4757_v52, %v1561_v58 }
 0x1f5   : > { %3509 = vst [vmem:[%s4764_s29 + $0x188] sm:$0xf] %v4022_v49  ;;  %v4024_v60 = vpack.c.bf16 %v2713_v54, %v2713_v54 }
 0x1f6   : > { %3508 = vst [vmem:[%s4764_s29 + $0x180] sm:$0xff] %v4021_v59  ;;  %v4023_v62 = vpack.c.bf16 %v2712_v61, %v2711_v57 }
 0x1f7   : > { %3511 = vst [vmem:[%s4764_s29 + $0x194] sm:$0xf] %v4024_v60 }
 0x1f8   : > { %v1884_v63 = vpop.f32.mrb[68].mxu1  ;;  %3510 = vst [vmem:[%s4764_s29 + $0x18c] sm:$0xff] %v4023_v62  ;;  %v1565_v1 = vpop.f32.mrb[68].mxu0 }
 0x1f9   : > { %v2716_v0 = vadd.f32 %v4752_v50, %v1884_v63  ;;  %v1886_v2 = vpop.f32.mrb[69].mxu1  ;;  %v2714_v3 = vadd.f32 %v4755_v51, %v1565_v1  ;;  %v1567_v4 = vpop.f32.mrb[69].mxu0 }
 0x1fa   : > { %v1887_v5 = vpop.f32.mrb[70].mxu1  ;;  %v2715_v7 = vadd.f32 %v4757_v52, %v1567_v4  ;;  %v1569_v9 = vpop.f32.mrb[70].mxu0 }
 0x1fb   : > { %v4026_v6 = vpack.c.bf16 %v2716_v0, %v2716_v0  ;;  %v2719_v8 = vadd.f32 %v4752_v50, %v1887_v5  ;;  %v1889_v10 = vpop.f32.mrb[71].mxu1  ;;  %v2717_v11 = vadd.f32 %v4755_v51, %v1569_v9  ;;  %v1571_v12 = vpop.f32.mrb[71].mxu0 }
 0x1fc   : > { %v4025_v13 = vpack.c.bf16 %v2715_v7, %v2714_v3  ;;  %v2718_v15 = vadd.f32 %v4757_v52, %v1571_v12 }
 0x1fd   : > { %3513 = vst [vmem:[%s4764_s29 + $0x1a0] sm:$0xf] %v4026_v6  ;;  %v4028_v14 = vpack.c.bf16 %v2719_v8, %v2719_v8 }
 0x1fe   : > { %3512 = vst [vmem:[%s4764_s29 + $0x198] sm:$0xff] %v4025_v13  ;;  %v4027_v16 = vpack.c.bf16 %v2718_v15, %v2717_v11 }
 0x1ff   : > { %3515 = vst [vmem:[%s4764_s29 + $0x1ac] sm:$0xf] %v4028_v14 }
 0x200   : > { %v1892_v17 = vpop.f32.mrb[72].mxu1  ;;  %3514 = vst [vmem:[%s4764_s29 + $0x1a4] sm:$0xff] %v4027_v16  ;;  %v1575_v19 = vpop.f32.mrb[72].mxu0 }
 0x201   : > { %v2722_v18 = vadd.f32 %v4752_v50, %v1892_v17  ;;  %v1894_v20 = vpop.f32.mrb[73].mxu1  ;;  %v2720_v21 = vadd.f32 %v4755_v51, %v1575_v19  ;;  %v1577_v22 = vpop.f32.mrb[73].mxu0 }
 0x202   : > { %v1895_v23 = vpop.f32.mrb[74].mxu1  ;;  %v2721_v25 = vadd.f32 %v4757_v52, %v1577_v22  ;;  %v1579_v27 = vpop.f32.mrb[74].mxu0 }
 0x203   : > { %v4030_v24 = vpack.c.bf16 %v2722_v18, %v2722_v18  ;;  %v2725_v26 = vadd.f32 %v4752_v50, %v1895_v23  ;;  %v1897_v28 = vpop.f32.mrb[75].mxu1  ;;  %v2723_v29 = vadd.f32 %v4755_v51, %v1579_v27  ;;  %v1581_v30 = vpop.f32.mrb[75].mxu0 }
 0x204   : > { %v4029_v31 = vpack.c.bf16 %v2721_v25, %v2720_v21  ;;  %v2724_v33 = vadd.f32 %v4757_v52, %v1581_v30 }
 0x205   : > { %3517 = vst [vmem:[%s4764_s29 + $0x1b8] sm:$0xf] %v4030_v24  ;;  %v4032_v32 = vpack.c.bf16 %v2725_v26, %v2725_v26 }
 0x206   : > { %3516 = vst [vmem:[%s4764_s29 + $0x1b0] sm:$0xff] %v4029_v31  ;;  %v4031_v34 = vpack.c.bf16 %v2724_v33, %v2723_v29 }
 0x207   : > { %3519 = vst [vmem:[%s4764_s29 + $0x1c4] sm:$0xf] %v4032_v32 }
 0x208   : > { %v1900_v35 = vpop.f32.mrb[76].mxu1  ;;  %3518 = vst [vmem:[%s4764_s29 + $0x1bc] sm:$0xff] %v4031_v34  ;;  %v1585_v37 = vpop.f32.mrb[76].mxu0 }
 0x209   : > { %v2728_v36 = vadd.f32 %v4752_v50, %v1900_v35  ;;  %v1902_v38 = vpop.f32.mrb[77].mxu1  ;;  %v2726_v39 = vadd.f32 %v4755_v51, %v1585_v37  ;;  %v1587_v40 = vpop.f32.mrb[77].mxu0 }
 0x20a   : > { %v1903_v41 = vpop.f32.mrb[78].mxu1  ;;  %v2727_v43 = vadd.f32 %v4757_v52, %v1587_v40  ;;  %v1589_v45 = vpop.f32.mrb[78].mxu0 }
 0x20b   : > { %v4034_v42 = vpack.c.bf16 %v2728_v36, %v2728_v36  ;;  %v2731_v44 = vadd.f32 %v4752_v50, %v1903_v41  ;;  %v1905_v46 = vpop.f32.mrb[79].mxu1  ;;  %v2729_v47 = vadd.f32 %v4755_v51, %v1589_v45  ;;  %v1591_v48 = vpop.f32.mrb[79].mxu0 }
 0x20c   : > { %v4033_v49 = vpack.c.bf16 %v2727_v43, %v2726_v39  ;;  %v2730_v54 = vadd.f32 %v4757_v52, %v1591_v48 }
 0x20d   : > { %3521 = vst [vmem:[%s4764_s29 + $0x1d0] sm:$0xf] %v4034_v42  ;;  %v4036_v53 = vpack.c.bf16 %v2731_v44, %v2731_v44 }
 0x20e   : > { %3520 = vst [vmem:[%s4764_s29 + $0x1c8] sm:$0xff] %v4033_v49  ;;  %v4035_v55 = vpack.c.bf16 %v2730_v54, %v2729_v47 }
 0x20f   : > { %3523 = vst [vmem:[%s4764_s29 + $0x1dc] sm:$0xf] %v4036_v53 }
 0x210   : > { %v1908_v56 = vpop.f32.mrb[80].mxu1  ;;  %3522 = vst [vmem:[%s4764_s29 + $0x1d4] sm:$0xff] %v4035_v55  ;;  %v1595_v58 = vpop.f32.mrb[80].mxu0 }
 0x211   : > { %v2734_v57 = vadd.f32 %v4752_v50, %v1908_v56  ;;  %v1910_v59 = vpop.f32.mrb[81].mxu1  ;;  %v2732_v60 = vadd.f32 %v4755_v51, %v1595_v58  ;;  %v1597_v61 = vpop.f32.mrb[81].mxu0 }
 0x212   : > { %v1911_v62 = vpop.f32.mrb[82].mxu1  ;;  %v2733_v0 = vadd.f32 %v4757_v52, %v1597_v61  ;;  %v1599_v2 = vpop.f32.mrb[82].mxu0 }
 0x213   : > { %v4038_v63 = vpack.c.bf16 %v2734_v57, %v2734_v57  ;;  %v2737_v1 = vadd.f32 %v4752_v50, %v1911_v62  ;;  %v1913_v3 = vpop.f32.mrb[83].mxu1  ;;  %v2735_v4 = vadd.f32 %v4755_v51, %v1599_v2  ;;  %v1601_v5 = vpop.f32.mrb[83].mxu0 }
 0x214   : > { %v4037_v6 = vpack.c.bf16 %v2733_v0, %v2732_v60  ;;  %v2736_v8 = vadd.f32 %v4757_v52, %v1601_v5 }
 0x215   : > { %3525 = vst [vmem:[%s4764_s29 + $0x1e8] sm:$0xf] %v4038_v63  ;;  %v4040_v7 = vpack.c.bf16 %v2737_v1, %v2737_v1 }
 0x216   : > { %3524 = vst [vmem:[%s4764_s29 + $0x1e0] sm:$0xff] %v4037_v6  ;;  %v4039_v9 = vpack.c.bf16 %v2736_v8, %v2735_v4 }
 0x217   : > { %3527 = vst [vmem:[%s4764_s29 + $0x1f4] sm:$0xf] %v4040_v7 }
 0x218   : > { %v1916_v10 = vpop.f32.mrb[84].mxu1  ;;  %3526 = vst [vmem:[%s4764_s29 + $0x1ec] sm:$0xff] %v4039_v9  ;;  %v1605_v12 = vpop.f32.mrb[84].mxu0 }
 0x219   : > { %v2740_v11 = vadd.f32 %v4752_v50, %v1916_v10  ;;  %v1918_v13 = vpop.f32.mrb[85].mxu1  ;;  %v2738_v14 = vadd.f32 %v4755_v51, %v1605_v12  ;;  %v1607_v15 = vpop.f32.mrb[85].mxu0 }
 0x21a   : > { %v1919_v16 = vpop.f32.mrb[86].mxu1  ;;  %v2739_v18 = vadd.f32 %v4757_v52, %v1607_v15  ;;  %v1609_v20 = vpop.f32.mrb[86].mxu0 }
 0x21b   : > { %v4042_v17 = vpack.c.bf16 %v2740_v11, %v2740_v11  ;;  %v2743_v19 = vadd.f32 %v4752_v50, %v1919_v16  ;;  %v1921_v21 = vpop.f32.mrb[87].mxu1  ;;  %v2741_v22 = vadd.f32 %v4755_v51, %v1609_v20  ;;  %v1611_v23 = vpop.f32.mrb[87].mxu0 }
 0x21c   : > { %v4041_v24 = vpack.c.bf16 %v2739_v18, %v2738_v14  ;;  %v2742_v26 = vadd.f32 %v4757_v52, %v1611_v23 }
 0x21d   : > { %3529 = vst [vmem:[%s4764_s29 + $0x200] sm:$0xf] %v4042_v17  ;;  %v4044_v25 = vpack.c.bf16 %v2743_v19, %v2743_v19 }
 0x21e   : > { %3528 = vst [vmem:[%s4764_s29 + $0x1f8] sm:$0xff] %v4041_v24  ;;  %v4043_v27 = vpack.c.bf16 %v2742_v26, %v2741_v22 }
 0x21f   : > { %3531 = vst [vmem:[%s4764_s29 + $0x20c] sm:$0xf] %v4044_v25 }
 0x220   : > { %v1924_v28 = vpop.f32.mrb[88].mxu1  ;;  %3530 = vst [vmem:[%s4764_s29 + $0x204] sm:$0xff] %v4043_v27  ;;  %v1615_v30 = vpop.f32.mrb[88].mxu0 }
 0x221   : > { %v2746_v29 = vadd.f32 %v4752_v50, %v1924_v28  ;;  %v1926_v31 = vpop.f32.mrb[89].mxu1  ;;  %v2744_v32 = vadd.f32 %v4755_v51, %v1615_v30  ;;  %v1617_v33 = vpop.f32.mrb[89].mxu0 }
 0x222   : > { %v1927_v34 = vpop.f32.mrb[90].mxu1  ;;  %v2745_v36 = vadd.f32 %v4757_v52, %v1617_v33  ;;  %v1619_v38 = vpop.f32.mrb[90].mxu0 }
 0x223   : > { %v4046_v35 = vpack.c.bf16 %v2746_v29, %v2746_v29  ;;  %v2749_v37 = vadd.f32 %v4752_v50, %v1927_v34  ;;  %v1929_v39 = vpop.f32.mrb[91].mxu1  ;;  %v2747_v40 = vadd.f32 %v4755_v51, %v1619_v38  ;;  %v1621_v41 = vpop.f32.mrb[91].mxu0 }
 0x224   : > { %v4045_v42 = vpack.c.bf16 %v2745_v36, %v2744_v32  ;;  %v2748_v44 = vadd.f32 %v4757_v52, %v1621_v41 }
 0x225   : > { %3533 = vst [vmem:[%s4764_s29 + $0x218] sm:$0xf] %v4046_v35  ;;  %v4048_v43 = vpack.c.bf16 %v2749_v37, %v2749_v37 }
 0x226   : > { %3532 = vst [vmem:[%s4764_s29 + $0x210] sm:$0xff] %v4045_v42  ;;  %v4047_v45 = vpack.c.bf16 %v2748_v44, %v2747_v40 }
 0x227   : > { %3535 = vst [vmem:[%s4764_s29 + $0x224] sm:$0xf] %v4048_v43 }
 0x228   : > { %v1932_v46 = vpop.f32.mrb[92].mxu1  ;;  %3534 = vst [vmem:[%s4764_s29 + $0x21c] sm:$0xff] %v4047_v45  ;;  %v1625_v48 = vpop.f32.mrb[92].mxu0 }
 0x229   : > { %v2752_v47 = vadd.f32 %v4752_v50, %v1932_v46  ;;  %v1934_v49 = vpop.f32.mrb[93].mxu1  ;;  %v2750_v53 = vadd.f32 %v4755_v51, %v1625_v48  ;;  %v1627_v54 = vpop.f32.mrb[93].mxu0 }
 0x22a   : > { %v1935_v55 = vpop.f32.mrb[94].mxu1  ;;  %v2751_v57 = vadd.f32 %v4757_v52, %v1627_v54  ;;  %v1629_v59 = vpop.f32.mrb[94].mxu0 }
 0x22b   : > { %v4050_v56 = vpack.c.bf16 %v2752_v47, %v2752_v47  ;;  %v2755_v58 = vadd.f32 %v4752_v50, %v1935_v55  ;;  %v1937_v60 = vpop.f32.mrb[95].mxu1  ;;  %v2753_v61 = vadd.f32 %v4755_v51, %v1629_v59  ;;  %v1631_v62 = vpop.f32.mrb[95].mxu0 }
 0x22c   : > { %v4049_v63 = vpack.c.bf16 %v2751_v57, %v2750_v53  ;;  %v2754_v1 = vadd.f32 %v4757_v52, %v1631_v62 }
 0x22d   : > { %3537 = vst [vmem:[%s4764_s29 + $0x230] sm:$0xf] %v4050_v56  ;;  %v4052_v0 = vpack.c.bf16 %v2755_v58, %v2755_v58 }
 0x22e   : > { %3536 = vst [vmem:[%s4764_s29 + $0x228] sm:$0xff] %v4049_v63  ;;  %v4051_v2 = vpack.c.bf16 %v2754_v1, %v2753_v61 }
 0x22f   : > { %3539 = vst [vmem:[%s4764_s29 + $0x23c] sm:$0xf] %v4052_v0 }
 0x230   : > { %v1940_v3 = vpop.f32.mrb[96].mxu1  ;;  %3538 = vst [vmem:[%s4764_s29 + $0x234] sm:$0xff] %v4051_v2  ;;  %v1635_v5 = vpop.f32.mrb[96].mxu0 }
 0x231   : > { %v2758_v4 = vadd.f32 %v4752_v50, %v1940_v3  ;;  %v1942_v6 = vpop.f32.mrb[97].mxu1  ;;  %v2756_v7 = vadd.f32 %v4755_v51, %v1635_v5  ;;  %v1637_v8 = vpop.f32.mrb[97].mxu0 }
 0x232   : > { %v1943_v9 = vpop.f32.mrb[98].mxu1  ;;  %v2757_v11 = vadd.f32 %v4757_v52, %v1637_v8  ;;  %v1639_v13 = vpop.f32.mrb[98].mxu0 }
 0x233   : > { %v4054_v10 = vpack.c.bf16 %v2758_v4, %v2758_v4  ;;  %v2761_v12 = vadd.f32 %v4752_v50, %v1943_v9  ;;  %v1945_v14 = vpop.f32.mrb[99].mxu1  ;;  %v2759_v15 = vadd.f32 %v4755_v51, %v1639_v13  ;;  %v1641_v16 = vpop.f32.mrb[99].mxu0 }
 0x234   : > { %v4053_v17 = vpack.c.bf16 %v2757_v11, %v2756_v7  ;;  %v2760_v19 = vadd.f32 %v4757_v52, %v1641_v16 }
 0x235   : > { %3541 = vst [vmem:[%s4764_s29 + $0x248] sm:$0xf] %v4054_v10  ;;  %v4056_v18 = vpack.c.bf16 %v2761_v12, %v2761_v12 }
 0x236   : > { %3540 = vst [vmem:[%s4764_s29 + $0x240] sm:$0xff] %v4053_v17  ;;  %v4055_v20 = vpack.c.bf16 %v2760_v19, %v2759_v15 }
 0x237   : > { %3543 = vst [vmem:[%s4764_s29 + $0x254] sm:$0xf] %v4056_v18 }
 0x238   : > { %v1948_v21 = vpop.f32.mrb[100].mxu1  ;;  %3542 = vst [vmem:[%s4764_s29 + $0x24c] sm:$0xff] %v4055_v20  ;;  %v1645_v23 = vpop.f32.mrb[100].mxu0 }
 0x239   : > { %v2764_v22 = vadd.f32 %v4752_v50, %v1948_v21  ;;  %v1950_v24 = vpop.f32.mrb[101].mxu1  ;;  %v2762_v25 = vadd.f32 %v4755_v51, %v1645_v23  ;;  %v1647_v26 = vpop.f32.mrb[101].mxu0 }
 0x23a   : > { %v1951_v27 = vpop.f32.mrb[102].mxu1  ;;  %v2763_v29 = vadd.f32 %v4757_v52, %v1647_v26  ;;  %v1649_v31 = vpop.f32.mrb[102].mxu0 }
 0x23b   : > { %v4058_v28 = vpack.c.bf16 %v2764_v22, %v2764_v22  ;;  %v2767_v30 = vadd.f32 %v4752_v50, %v1951_v27  ;;  %v1953_v32 = vpop.f32.mrb[103].mxu1  ;;  %v2765_v33 = vadd.f32 %v4755_v51, %v1649_v31  ;;  %v1651_v34 = vpop.f32.mrb[103].mxu0 }
 0x23c   : > { %v4057_v35 = vpack.c.bf16 %v2763_v29, %v2762_v25  ;;  %v2766_v37 = vadd.f32 %v4757_v52, %v1651_v34 }
 0x23d   : > { %3545 = vst [vmem:[%s4764_s29 + $0x260] sm:$0xf] %v4058_v28  ;;  %v4060_v36 = vpack.c.bf16 %v2767_v30, %v2767_v30 }
 0x23e   : > { %3544 = vst [vmem:[%s4764_s29 + $0x258] sm:$0xff] %v4057_v35  ;;  %v4059_v38 = vpack.c.bf16 %v2766_v37, %v2765_v33 }
 0x23f   : > { %3547 = vst [vmem:[%s4764_s29 + $0x26c] sm:$0xf] %v4060_v36 }
 0x240   : > { %v1956_v39 = vpop.f32.mrb[104].mxu1  ;;  %3546 = vst [vmem:[%s4764_s29 + $0x264] sm:$0xff] %v4059_v38  ;;  %v1655_v41 = vpop.f32.mrb[104].mxu0 }
 0x241   : > { %v2770_v40 = vadd.f32 %v4752_v50, %v1956_v39  ;;  %v1958_v42 = vpop.f32.mrb[105].mxu1  ;;  %v2768_v43 = vadd.f32 %v4755_v51, %v1655_v41  ;;  %v1657_v44 = vpop.f32.mrb[105].mxu0 }
 0x242   : > { %v1959_v45 = vpop.f32.mrb[106].mxu1  ;;  %v2769_v47 = vadd.f32 %v4757_v52, %v1657_v44  ;;  %v1659_v49 = vpop.f32.mrb[106].mxu0 }
 0x243   : > { %v4062_v46 = vpack.c.bf16 %v2770_v40, %v2770_v40  ;;  %v2773_v48 = vadd.f32 %v4752_v50, %v1959_v45  ;;  %v1961_v53 = vpop.f32.mrb[107].mxu1  ;;  %v2771_v54 = vadd.f32 %v4755_v51, %v1659_v49  ;;  %v1661_v55 = vpop.f32.mrb[107].mxu0 }
 0x244   : > { %v4061_v56 = vpack.c.bf16 %v2769_v47, %v2768_v43  ;;  %v2772_v58 = vadd.f32 %v4757_v52, %v1661_v55 }
 0x245   : > { %3549 = vst [vmem:[%s4764_s29 + $0x278] sm:$0xf] %v4062_v46  ;;  %v4064_v57 = vpack.c.bf16 %v2773_v48, %v2773_v48 }
 0x246   : > { %3548 = vst [vmem:[%s4764_s29 + $0x270] sm:$0xff] %v4061_v56  ;;  %v4063_v59 = vpack.c.bf16 %v2772_v58, %v2771_v54 }
 0x247   : > { %3551 = vst [vmem:[%s4764_s29 + $0x284] sm:$0xf] %v4064_v57 }
 0x248   : > { %v1964_v60 = vpop.f32.mrb[108].mxu1  ;;  %3550 = vst [vmem:[%s4764_s29 + $0x27c] sm:$0xff] %v4063_v59  ;;  %v1665_v62 = vpop.f32.mrb[108].mxu0 }
 0x249   : > { %v2776_v61 = vadd.f32 %v4752_v50, %v1964_v60  ;;  %v1966_v63 = vpop.f32.mrb[109].mxu1  ;;  %v2774_v0 = vadd.f32 %v4755_v51, %v1665_v62  ;;  %v1667_v1 = vpop.f32.mrb[109].mxu0 }
 0x24a   : > { %v1967_v2 = vpop.f32.mrb[110].mxu1  ;;  %v2775_v4 = vadd.f32 %v4757_v52, %v1667_v1  ;;  %v1669_v6 = vpop.f32.mrb[110].mxu0 }
 0x24b   : > { %v4066_v3 = vpack.c.bf16 %v2776_v61, %v2776_v61  ;;  %v2779_v5 = vadd.f32 %v4752_v50, %v1967_v2  ;;  %v1969_v7 = vpop.f32.mrb[111].mxu1  ;;  %v2777_v8 = vadd.f32 %v4755_v51, %v1669_v6  ;;  %v1671_v9 = vpop.f32.mrb[111].mxu0 }
 0x24c   : > { %v4065_v10 = vpack.c.bf16 %v2775_v4, %v2774_v0  ;;  %v2778_v12 = vadd.f32 %v4757_v52, %v1671_v9 }
 0x24d   : > { %3553 = vst [vmem:[%s4764_s29 + $0x290] sm:$0xf] %v4066_v3  ;;  %v4068_v11 = vpack.c.bf16 %v2779_v5, %v2779_v5 }
 0x24e   : > { %3552 = vst [vmem:[%s4764_s29 + $0x288] sm:$0xff] %v4065_v10  ;;  %v4067_v13 = vpack.c.bf16 %v2778_v12, %v2777_v8 }
 0x24f   : > { %3555 = vst [vmem:[%s4764_s29 + $0x29c] sm:$0xf] %v4068_v11 }
 0x250   : > { %v1972_v14 = vpop.f32.mrb[112].mxu1  ;;  %3554 = vst [vmem:[%s4764_s29 + $0x294] sm:$0xff] %v4067_v13  ;;  %v1675_v16 = vpop.f32.mrb[112].mxu0 }
 0x251   : > { %v2782_v15 = vadd.f32 %v4752_v50, %v1972_v14  ;;  %v1974_v17 = vpop.f32.mrb[113].mxu1  ;;  %v2780_v18 = vadd.f32 %v4755_v51, %v1675_v16  ;;  %v1677_v19 = vpop.f32.mrb[113].mxu0 }
 0x252   : > { %v1975_v20 = vpop.f32.mrb[114].mxu1  ;;  %v2781_v22 = vadd.f32 %v4757_v52, %v1677_v19  ;;  %v1679_v24 = vpop.f32.mrb[114].mxu0 }
 0x253   : > { %v4070_v21 = vpack.c.bf16 %v2782_v15, %v2782_v15  ;;  %v2785_v23 = vadd.f32 %v4752_v50, %v1975_v20  ;;  %v1977_v25 = vpop.f32.mrb[115].mxu1  ;;  %v2783_v26 = vadd.f32 %v4755_v51, %v1679_v24  ;;  %v1681_v27 = vpop.f32.mrb[115].mxu0 }
 0x254   : > { %v4069_v28 = vpack.c.bf16 %v2781_v22, %v2780_v18  ;;  %v2784_v30 = vadd.f32 %v4757_v52, %v1681_v27 }
 0x255   : > { %3557 = vst [vmem:[%s4764_s29 + $0x2a8] sm:$0xf] %v4070_v21  ;;  %v4072_v29 = vpack.c.bf16 %v2785_v23, %v2785_v23 }
 0x256   : > { %3556 = vst [vmem:[%s4764_s29 + $0x2a0] sm:$0xff] %v4069_v28  ;;  %v4071_v31 = vpack.c.bf16 %v2784_v30, %v2783_v26 }
 0x257   : > { %3559 = vst [vmem:[%s4764_s29 + $0x2b4] sm:$0xf] %v4072_v29 }
 0x258   : > { %v1980_v32 = vpop.f32.mrb[116].mxu1  ;;  %3558 = vst [vmem:[%s4764_s29 + $0x2ac] sm:$0xff] %v4071_v31  ;;  %v1685_v34 = vpop.f32.mrb[116].mxu0 }
 0x259   : > { %v2788_v33 = vadd.f32 %v4752_v50, %v1980_v32  ;;  %v1982_v35 = vpop.f32.mrb[117].mxu1  ;;  %v2786_v36 = vadd.f32 %v4755_v51, %v1685_v34  ;;  %v1687_v37 = vpop.f32.mrb[117].mxu0 }
 0x25a   : > { %v1983_v38 = vpop.f32.mrb[118].mxu1  ;;  %v2787_v40 = vadd.f32 %v4757_v52, %v1687_v37  ;;  %v1689_v42 = vpop.f32.mrb[118].mxu0 }
 0x25b   : > { %v4074_v39 = vpack.c.bf16 %v2788_v33, %v2788_v33  ;;  %v2791_v41 = vadd.f32 %v4752_v50, %v1983_v38  ;;  %v1985_v43 = vpop.f32.mrb[119].mxu1  ;;  %v2789_v44 = vadd.f32 %v4755_v51, %v1689_v42  ;;  %v1691_v45 = vpop.f32.mrb[119].mxu0 }
 0x25c   : > { %v4073_v46 = vpack.c.bf16 %v2787_v40, %v2786_v36  ;;  %v2790_v48 = vadd.f32 %v4757_v52, %v1691_v45 }
 0x25d   : > { %3561 = vst [vmem:[%s4764_s29 + $0x2c0] sm:$0xf] %v4074_v39  ;;  %v4076_v47 = vpack.c.bf16 %v2791_v41, %v2791_v41 }
 0x25e   : > { %3560 = vst [vmem:[%s4764_s29 + $0x2b8] sm:$0xff] %v4073_v46  ;;  %v4075_v49 = vpack.c.bf16 %v2790_v48, %v2789_v44 }
 0x25f   : > { %3563 = vst [vmem:[%s4764_s29 + $0x2cc] sm:$0xf] %v4076_v47 }
 0x260   : > { %v1988_v53 = vpop.f32.mrb[120].mxu1  ;;  %3562 = vst [vmem:[%s4764_s29 + $0x2c4] sm:$0xff] %v4075_v49  ;;  %v1695_v55 = vpop.f32.mrb[120].mxu0 }
 0x261   : > { %v2794_v54 = vadd.f32 %v4752_v50, %v1988_v53  ;;  %v1990_v56 = vpop.f32.mrb[121].mxu1  ;;  %v2792_v57 = vadd.f32 %v4755_v51, %v1695_v55  ;;  %v1697_v58 = vpop.f32.mrb[121].mxu0 }
 0x262   : > { %v1991_v59 = vpop.f32.mrb[122].mxu1  ;;  %v2793_v61 = vadd.f32 %v4757_v52, %v1697_v58  ;;  %v1699_v63 = vpop.f32.mrb[122].mxu0 }
 0x263   : > { %v4078_v60 = vpack.c.bf16 %v2794_v54, %v2794_v54  ;;  %v2797_v62 = vadd.f32 %v4752_v50, %v1991_v59  ;;  %v1993_v0 = vpop.f32.mrb[123].mxu1  ;;  %v2795_v1 = vadd.f32 %v4755_v51, %v1699_v63  ;;  %v1701_v2 = vpop.f32.mrb[123].mxu0 }
 0x264   : > { %v4077_v3 = vpack.c.bf16 %v2793_v61, %v2792_v57  ;;  %v2796_v5 = vadd.f32 %v4757_v52, %v1701_v2 }
 0x265   : > { %3565 = vst [vmem:[%s4764_s29 + $0x2d8] sm:$0xf] %v4078_v60  ;;  %v4080_v4 = vpack.c.bf16 %v2797_v62, %v2797_v62 }
 0x266   : > { %3564 = vst [vmem:[%s4764_s29 + $0x2d0] sm:$0xff] %v4077_v3  ;;  %v4079_v6 = vpack.c.bf16 %v2796_v5, %v2795_v1 }
 0x267   : > { %3567 = vst [vmem:[%s4764_s29 + $0x2e4] sm:$0xf] %v4080_v4 }
 0x268   : > { %v1996_v7 = vpop.f32.mrb[124].mxu1  ;;  %3566 = vst [vmem:[%s4764_s29 + $0x2dc] sm:$0xff] %v4079_v6  ;;  %v1705_v9 = vpop.f32.mrb[124].mxu0 }
 0x269   : > { %v2800_v8 = vadd.f32 %v4752_v50, %v1996_v7  ;;  %v1998_v10 = vpop.f32.mrb[125].mxu1  ;;  %v2798_v11 = vadd.f32 %v4755_v51, %v1705_v9  ;;  %v1707_v12 = vpop.f32.mrb[125].mxu0 }
 0x26a   : > { %v1999_v13 = vpop.f32.mrb[126].mxu1  ;;  %v2799_v15 = vadd.f32 %v4757_v52, %v1707_v12  ;;  %v1709_v17 = vpop.f32.mrb[126].mxu0 }
 0x26b   : > { %v4082_v14 = vpack.c.bf16 %v2800_v8, %v2800_v8  ;;  %v2803_v16 = vadd.f32 %v4752_v50, %v1999_v13  ;;  %v2001_v18 = vpop.f32.mrb[127].mxu1  ;;  %v2801_v19 = vadd.f32 %v4755_v51, %v1709_v17  ;;  %v1711_v20 = vpop.f32.mrb[127].mxu0 }
 0x26c   : > { %v4081_v21 = vpack.c.bf16 %v2799_v15, %v2798_v11  ;;  %v2802_v23 = vadd.f32 %v4757_v52, %v1711_v20 }
 0x26d   : > { %3569 = vst [vmem:[%s4764_s29 + $0x2f0] sm:$0xf] %v4082_v14  ;;  %v4084_v22 = vpack.c.bf16 %v2803_v16, %v2803_v16 }
 0x26e   : > { %3568 = vst [vmem:[%s4764_s29 + $0x2e8] sm:$0xff] %v4081_v21  ;;  %v4083_v50 = vpack.c.bf16 %v2802_v23, %v2801_v19 }
 0x26f   : > { %3571 = vst [vmem:[%s4764_s29 + $0x2fc] sm:$0xf] %v4084_v22 }
 0x270   : > { %3570 = vst [vmem:[%s4764_s29 + $0x2f4] sm:$0xff] %v4083_v50 }
 0x271   : > { %4402 = shalt.err (!%p4399_p0)
}
 0x272   : > { %s4403_s8 = scalar_lea.hbm %s5083_s22, 12288  ;;  %s4407_s23 = scalar_lea.hbm %s5140_s3, 24576 }
 0x273   : > { %p4404_p4 = scmp.ne.s32.totalorder %s5083_s22, %s4403_s8  ;;  %p4408_p2 = scmp.lt.u32.totalorder %s5083_s22, %s5140_s3 }
 0x274   : > { %p4409_p9 = scmp.lt.u32.totalorder %s4407_s23, %s4403_s8  ;;  %p4411_p11 = scmp.lt.u32.totalorder %s4403_s8, %s5083_s22 }
 0x275   : > { %p4405_p6 = pnand %p4404_p4, %p5162_p13 }
 0x276   : > { %p4410_p10 = por %p4409_p9, %p4408_p2 }
 0x277   : > { %p4406_p12 = pneg %p4405_p6 }
 0x278   : > { %p4412_p5 = por %p4411_p11, %p4410_p10 }
 0x27a   : > { %p4413_p1 = pnand %p4412_p5, %p4406_p12 }
 0x27c   : > { %4416 = shalt.err (!%p4413_p1)
}
 0x27d   : > { %s4486_s29 = smov 192   ;;  %s4487_s27 = smov 384  }
 0x27e   : > { %s4488_s15 = smov 12  }
 0x27f   : > { %4095 = dma.vmem_to_hbm [thread:$0]  (%p5162_p13), %s5085_s19, 12288, %s5083_s22, %s3573_s6, %s4486_s29, %s4487_s27, %s4488_s15  }
 0x280 PF: > { %s3604_s28 = sand.u32 1, %s4455_s12   ;;  %p5163_p3 = scmp.ne.s32.totalorder %s5151_s25, 0 }
 0x281   : > { %p5164_p7 = scmp.ge.s32.totalorder %s4475_s17, 2  ;;  %s3605_s7 = scalar_lea.sflag [#allocation5], %s3604_s28 }
 0x283   : > { %p4106_p8 = pnand %p5164_p7, %p5163_p3 }
 0x285   : > { %4450 = dma.done.wait (!%p4106_p8), %s3605_s7, 12288  }
 0x286   : > { %4452 = vsyncadd (!%p4106_p8), %s3605_s7, 4294955008  ;;  %s20_s17 = sadd.s32 1, %s4475_s17   ;;  %s5165_s12 = smov %s4459_s13 }
 0x287   : > { %p17_p0 = scmp.ge.s32.totalorder %s20_s17, 4   ;;  %s5166_s13 = smov %s4463_s14 }
 0x288   : > { %s5167_s14 = smov %s4635_s5  ;;  %s5168_s15 = smov %s4471_s16 }
 0x289   : > { %s5169_s16 = smov %s5171_s4  ;;  %19 = sbr.rel (!%p17_p0) target bundleno = 7 (0x7), region = 94 }
 0x290   :  { %3610 = vsyncpa [#allocation4], 1 }
 0x291   :  { %3612 = vsyncpa [#allocation4 + $0x1], 1 }
 0x292   :  { %3613 = vsyncpa [#allocation7], 1 }
 0x293   :  { %3615 = vsyncpa [#allocation7 + $0x1], 1 }
 0x294   :  { %3616 = vsyncpa [#allocation5], 1 }
 0x295   :  { %3618 = vsyncpa [#allocation5 + $0x1], 1 }

</bundles_post_ra>
